<compile_context>
chip_gen: v5e
topology: v5e:2x2
jax: 0.10.0
libtpu: 0.0.40
codegen_flags: <defaults>
</compile_context>

<pallas_src>
import jax
import jax.numpy as jnp
from jax.experimental import pallas as pl
from jax.experimental.pallas import tpu as pltpu


# ---------------------------------------------------------------------------
# Fused kernel: grid = (phase l, node-row tile i, reduction tile k)
#   phase 0: acc += A[i,k] @ (X[k] @ W1);  epilogue: HW2[i] = relu(acc+b1) @ W2
#   phase 1: acc += A[i,k] @ HW2[k];       epilogue: pool += P[:,i] @ relu(acc+b2)
#   final step: out = relu(pool @ Wc1 + bc1) @ Wc2 + bc2
# ---------------------------------------------------------------------------
def gnn_fused_kernel(a_ref, x_ref, w1_ref, b1_ref, w2_ref, b2_ref, p_ref,
                     wc1_ref, bc1_ref, wc2_ref, bc2_ref,
                     out_ref, acc_ref, pool_ref, hw2_ref):
    l = pl.program_id(0)
    i = pl.program_id(1)
    k = pl.program_id(2)
    last_i = pl.num_programs(1) - 1
    last_k = pl.num_programs(2) - 1
    tm = acc_ref.shape[0]
    tk = a_ref.shape[1]

    @pl.when((l == 0) & (i == 0) & (k == 0))
    def _init():
        # Padded source rows of HW2 may never be written in phase 0 when the
        # reduction axis is padded further than the row axis; zero once so the
        # phase-1 reads are well-defined (they are multiplied by zero A cols).
        hw2_ref[...] = jnp.zeros_like(hw2_ref)
        pool_ref[...] = jnp.zeros_like(pool_ref)

    @pl.when(k == 0)
    def _zero_acc():
        acc_ref[...] = jnp.zeros_like(acc_ref)

    # -------------------- phase 0: GCN layer 1 --------------------
    @pl.when(l == 0)
    def _layer1():
        # Feature transform on the fly (K = in_dim is tiny vs. the A matmul).
        hw1 = jnp.dot(x_ref[...], w1_ref[...],
                      preferred_element_type=jnp.float32).astype(jnp.bfloat16)
        acc_ref[...] += jnp.dot(a_ref[...], hw1,
                                preferred_element_type=jnp.float32)

        @pl.when(k == last_k)
        def _epilogue1():
            # bias + ReLU in f32; H1 tile is immediately transformed by W2 and
            # cached in VMEM, so H1 / HW2 never touch HBM.
            h1 = jnp.maximum(acc_ref[...] + b1_ref[...], 0.0).astype(jnp.bfloat16)
            row = pl.multiple_of(i * tm, 128)
            hw2_ref[pl.ds(row, tm), :] = jnp.dot(
                h1, w2_ref[...], preferred_element_type=jnp.float32
            ).astype(jnp.bfloat16)

    # ------------- phase 1: GCN layer 2 + mean pool + classifier -------------
    @pl.when(l == 1)
    def _layer2():
        col = pl.multiple_of(k * tk, 128)
        acc_ref[...] += jnp.dot(a_ref[...], hw2_ref[pl.ds(col, tk), :],
                                preferred_element_type=jnp.float32)

        @pl.when(k == last_k)
        def _epilogue2():
            h2 = jnp.maximum(acc_ref[...] + b2_ref[...], 0.0).astype(jnp.bfloat16)
            # mean-pool contribution of this node tile (P columns beyond N are 0).
            pool_ref[...] += jnp.dot(p_ref[...], h2,
                                     preferred_element_type=jnp.float32)

        @pl.when((i == last_i) & (k == last_k))
        def _classify():
            g = pool_ref[...]                                       # [gp, fh] f32
            c = jnp.maximum(
                jnp.dot(g, wc1_ref[...], preferred_element_type=jnp.float32)
                + bc1_ref[...], 0.0)
            out_ref[...] = (jnp.dot(c, wc2_ref[...],
                                    preferred_element_type=jnp.float32)
                            + bc2_ref[...])


# ---------------------------------------------------------------------------
# Wrapper: padding, bf16 casts, single pallas_call
# ---------------------------------------------------------------------------
def _round_up(x, m):
    return (x + m - 1) // m * m


def _pad2(arr, rows, cols):
    return jnp.pad(arr, ((0, rows - arr.shape[0]), (0, cols - arr.shape[1])))


def gnn_forward(a_norm, pool, x, params, *, tm=256, tk=256):
    """Fused 2-layer GCN + mean readout + MLP classifier in one pallas_call."""
    # tm is also a lane dim (P block) / dynamic-slice offset; tk is a lane dim
    # of the A block -> both must be multiples of 128 (also covers bf16 x16).
    assert tm % 128 == 0 and tk % 128 == 0, "tiles must be multiples of 128"
    w1, b1, w2, b2, wc1, bc1, wc2, bc2 = params

    N, in_dim = x.shape
    hid = w1.shape[1]
    G = pool.shape[0]
    C = wc2.shape[1]

    LANE = 128
    fh = _round_up(hid, LANE)          # hidden dim -> lane-dense 128
    cp = _round_up(C, LANE)            # classes -> lane-dense 128
    gp = _round_up(G, 16)              # bf16 sublane packing for P rows
    # Independent padding: one tile of slack per axis, no lcm blow-up.
    n_rows = _round_up(N, tm)          # destination-node (row) axis
    n_cols = _round_up(N, tk)          # source-node / reduction axis
    n_max = max(n_rows, n_cols)
    num_i = n_rows // tm
    num_k = n_cols // tk

    # bf16 storage for the bandwidth-bound operands; f32 MXU accumulation.
    a_p = _pad2(a_norm, n_rows, n_cols).astype(jnp.bfloat16)
    x_p = _pad2(x, n_cols, in_dim).astype(jnp.bfloat16)     # in_dim NOT padded
    p_p = _pad2(pool, gp, n_rows).astype(jnp.bfloat16)
    w1_p = _pad2(w1, in_dim, fh).astype(jnp.bfloat16)
    w2_p = _pad2(w2, fh, fh).astype(jnp.bfloat16)
    b1_p = _pad2(b1, 1, fh).astype(jnp.float32)
    b2_p = _pad2(b2, 1, fh).astype(jnp.float32)
    wc1_p = _pad2(wc1, fh, fh).astype(jnp.float32)
    bc1_p = _pad2(bc1, 1, fh).astype(jnp.float32)
    wc2_p = _pad2(wc2, fh, cp).astype(jnp.float32)
    bc2_p = _pad2(bc2, 1, cp).astype(jnp.float32)

    # Usage with tm=tk=256 is < 1 MiB; keep the cap well under v7x's 64 MiB
    # physical VMEM even if callers bump the tiles to 512.
    vmem_limit = 48 * 1024 * 1024

    out_p = pl.pallas_call(
        gnn_fused_kernel,
        out_shape=jax.ShapeDtypeStruct((gp, cp), jnp.float32),
        grid=(2, num_i, num_k),
        in_specs=[
            pl.BlockSpec((tm, tk), lambda l, i, k: (i, k)),        # A_norm
            pl.BlockSpec((tk, in_dim), lambda l, i, k: (k, 0)),    # X (8 lanes)
            pl.BlockSpec((in_dim, fh), lambda l, i, k: (0, 0)),    # W1
            pl.BlockSpec((1, fh), lambda l, i, k: (0, 0)),         # b1
            pl.BlockSpec((fh, fh), lambda l, i, k: (0, 0)),        # W2
            pl.BlockSpec((1, fh), lambda l, i, k: (0, 0)),         # b2
            pl.BlockSpec((gp, tm), lambda l, i, k: (0, i)),        # P (mean pool)
            pl.BlockSpec((fh, fh), lambda l, i, k: (0, 0)),        # Wc1
            pl.BlockSpec((1, fh), lambda l, i, k: (0, 0)),         # bc1
            pl.BlockSpec((fh, cp), lambda l, i, k: (0, 0)),        # Wc2
            pl.BlockSpec((1, cp), lambda l, i, k: (0, 0)),         # bc2
        ],
        out_specs=pl.BlockSpec((gp, cp), lambda l, i, k: (0, 0)),
        scratch_shapes=[
            pltpu.VMEM((tm, fh), jnp.float32),      # per-tile f32 accumulator
            pltpu.VMEM((gp, fh), jnp.float32),      # mean-pool accumulator
            pltpu.VMEM((n_max, fh), jnp.bfloat16),  # VMEM-resident HW2 = H1 @ W2
        ],
        compiler_params=pltpu.CompilerParams(
            # phase 1 consumes the HW2 scratch written by phase 0 and the pool
            # accumulator carries across i -> every axis must stay sequential.
            dimension_semantics=("arbitrary", "arbitrary", "arbitrary"),
            vmem_limit_bytes=vmem_limit),
    )(a_p, x_p, w1_p, b1_p, w2_p, b2_p, p_p, wc1_p, bc1_p, wc2_p, bc2_p)

    return out_p[:G, :C]


# ---------------------------------------------------------------------------
# Plain-JAX glue: dense normalized adjacency + mean-pool matrix
# ---------------------------------------------------------------------------
def gcn_norm_dense(edge_index, num_nodes):
    """PyG gcn_norm (add_self_loops=True) as dense A_norm[dst, src]."""
    src, dst = edge_index[0], edge_index[1]
    deg = jnp.zeros((num_nodes,), jnp.float32).at[dst].add(1.0) + 1.0
    dinv = jax.lax.rsqrt(deg)
    a = jnp.zeros((num_nodes, num_nodes), jnp.float32)
    a = a.at[dst, src].add(dinv[dst] * dinv[src])
    a = a + jnp.diag(dinv * dinv)
    return a


def mean_pool_matrix(batch, num_graphs, num_nodes):
    """P[g, i] = 1/|V_g| if batch[i] == g else 0 (global_mean_pool as matmul)."""
    onehot = (batch[None, :] == jnp.arange(num_graphs)[:, None]).astype(jnp.float32)
    counts = jnp.maximum(onehot.sum(axis=1, keepdims=True), 1.0)
    return onehot / counts


# ---------------------------------------------------------------------------
# Main
# ---------------------------------------------------------------------------
if __name__ == "__main__":
    key = jax.random.PRNGKey(0)
    N, E, G = 160, 600, 4               # nodes, edges, graphs in the batch
    in_dim, hid_dim, num_classes = 8, 32, 2

    ks = jax.random.split(key, 8)
    x = jax.random.normal(ks[0], (N, in_dim), jnp.float32)
    src = jax.random.randint(ks[1], (E,), 0, N)
    dst = jax.random.randint(ks[2], (E,), 0, N)
    edge_index = jnp.stack([src, dst])                       # [2, E]
    batch = jnp.sort(jax.random.randint(ks[3], (N,), 0, G))  # node -> graph id

    # Weights stored [in, out] (transposed relative to torch.nn.Linear).
    def init_linear(k, fan_in, fan_out):
        kw, kb = jax.random.split(k)
        bound = 1.0 / float(fan_in) ** 0.5
        w = jax.random.uniform(kw, (fan_in, fan_out), jnp.float32, -bound, bound)
        b = jax.random.uniform(kb, (1, fan_out), jnp.float32, -bound, bound)
        return w, b

    w1, b1 = init_linear(ks[4], in_dim, hid_dim)         # GCNConv 1
    w2, b2 = init_linear(ks[5], hid_dim, hid_dim)        # GCNConv 2
    wc1, bc1 = init_linear(ks[6], hid_dim, hid_dim)      # classifier Linear 1
    wc2, bc2 = init_linear(ks[7], hid_dim, num_classes)  # classifier Linear 2
    params = (w1, b1, w2, b2, wc1, bc1, wc2, bc2)

    a_norm = gcn_norm_dense(edge_index, N)               # [N, N]
    pool = mean_pool_matrix(batch, G, N)                 # [G, N]

    # Defaults tm=tk=256: full MXU-sized tiles, grid collapses to (2, 1, 1).
    out = gnn_forward(a_norm, pool, x, params)
    out = jax.block_until_ready(out)

    # Pure-JAX reference mirroring the kernel's bf16 quantization points
    # (f32 MXU accumulation everywhere) to validate the fused pipeline.
    def q(t):
        return t.astype(jnp.bfloat16).astype(jnp.float32)

    a_q = q(a_norm)
    hw1 = q(q(x) @ q(w1))
    h1 = q(jnp.maximum(a_q @ hw1 + b1, 0.0))
    hw2 = q(h1 @ q(w2))
    h2 = q(jnp.maximum(a_q @ hw2 + b2, 0.0))
    g = q(pool) @ h2
    ref = jnp.maximum(g @ wc1 + bc1, 0.0) @ wc2 + bc2

    assert out.shape == (G, num_classes)
    assert jnp.allclose(out, ref, atol=2e-2, rtol=2e-2), (out, ref)
    print("KERNEL_OK")
</pallas_src>

<mosaic_0001>
module attributes {stable_mosaic.version = 11 : i64} {
  func.func @gnn_fused_kernel(%arg0: i32, %arg1: i32, %arg2: i32, %arg3: memref<256x256xbf16, #tpu.memory_space<vmem>>, %arg4: memref<256x8xbf16, #tpu.memory_space<vmem>>, %arg5: memref<8x128xbf16, #tpu.memory_space<vmem>>, %arg6: memref<1x128xf32, #tpu.memory_space<vmem>>, %arg7: memref<128x128xbf16, #tpu.memory_space<vmem>>, %arg8: memref<1x128xf32, #tpu.memory_space<vmem>>, %arg9: memref<16x256xbf16, #tpu.memory_space<vmem>>, %arg10: memref<128x128xf32, #tpu.memory_space<vmem>>, %arg11: memref<1x128xf32, #tpu.memory_space<vmem>>, %arg12: memref<128x128xf32, #tpu.memory_space<vmem>>, %arg13: memref<1x128xf32, #tpu.memory_space<vmem>>, %arg14: memref<16x128xf32, #tpu.memory_space<vmem>>, %arg15: memref<256x128xf32, #tpu.memory_space<vmem>>, %arg16: memref<16x128xf32, #tpu.memory_space<vmem>>, %arg17: memref<256x128xbf16, #tpu.memory_space<vmem>>) attributes {dimension_semantics = [#tpu.dimension_semantics<arbitrary>, #tpu.dimension_semantics<arbitrary>, #tpu.dimension_semantics<arbitrary>], iteration_bounds = array<i64: 2, 1, 1>, scalar_prefetch = 0 : i64, scratch_operands = 3 : i64, tpu.core_type = #tpu.core_type<tc>, window_params = [{transform_indices = @transform_0, window_bounds = array<i64: 256, 256>}, {transform_indices = @transform_1, window_bounds = array<i64: 256, 8>}, {pipeline_mode = #tpu.pipeline_mode<synchronous>, transform_indices = @transform_2, window_bounds = array<i64: 8, 128>}, {pipeline_mode = #tpu.pipeline_mode<synchronous>, transform_indices = @transform_3, window_bounds = array<i64: 1, 128>}, {pipeline_mode = #tpu.pipeline_mode<synchronous>, transform_indices = @transform_4, window_bounds = array<i64: 128, 128>}, {pipeline_mode = #tpu.pipeline_mode<synchronous>, transform_indices = @transform_5, window_bounds = array<i64: 1, 128>}, {transform_indices = @transform_6, window_bounds = array<i64: 16, 256>}, {pipeline_mode = #tpu.pipeline_mode<synchronous>, transform_indices = @transform_7, window_bounds = array<i64: 128, 128>}, {pipeline_mode = #tpu.pipeline_mode<synchronous>, transform_indices = @transform_8, window_bounds = array<i64: 1, 128>}, {pipeline_mode = #tpu.pipeline_mode<synchronous>, transform_indices = @transform_9, window_bounds = array<i64: 128, 128>}, {pipeline_mode = #tpu.pipeline_mode<synchronous>, transform_indices = @transform_10, window_bounds = array<i64: 1, 128>}, {pipeline_mode = #tpu.pipeline_mode<synchronous>, transform_indices = @transform_11, window_bounds = array<i64: 16, 128>}]} {
    %c0_i32 = arith.constant 0 : i32
    %0 = arith.cmpi eq, %arg0, %c0_i32 : i32
    %c0_i32_0 = arith.constant 0 : i32
    %1 = arith.cmpi eq, %arg1, %c0_i32_0 : i32
    %2 = arith.andi %0, %1 : i1
    %c0_i32_1 = arith.constant 0 : i32
    %3 = arith.cmpi eq, %arg2, %c0_i32_1 : i32
    %4 = arith.andi %2, %3 : i1
    %5 = arith.extui %4 : i1 to i32
    %c0_i32_2 = arith.constant 0 : i32
    %6 = arith.cmpi ne, %5, %c0_i32_2 : i32
    scf.if %6 {
      %cst = arith.constant 0.000000e+00 : bf16
      %16 = vector.broadcast %cst : bf16 to vector<256x128xbf16>
      %c0 = arith.constant 0 : index
      %c0_8 = arith.constant 0 : index
      %17 = vector.load %arg17[%c0, %c0_8] : memref<256x128xbf16, #tpu.memory_space<vmem>>, vector<256x128xbf16>
      tpu.vector_store %arg17[%c0, %c0_8], %16 {strides = array<i32>} : memref<256x128xbf16, #tpu.memory_space<vmem>>, vector<256x128xbf16>,
      %cst_9 = arith.constant 0.000000e+00 : f32
      %18 = vector.broadcast %cst_9 : f32 to vector<16x128xf32>
      %c0_10 = arith.constant 0 : index
      %c0_11 = arith.constant 0 : index
      %19 = vector.load %arg16[%c0_10, %c0_11] : memref<16x128xf32, #tpu.memory_space<vmem>>, vector<16x128xf32>
      tpu.vector_store %arg16[%c0_10, %c0_11], %18 {strides = array<i32>} : memref<16x128xf32, #tpu.memory_space<vmem>>, vector<16x128xf32>,
    } else {
    }
    %c0_i32_3 = arith.constant 0 : i32
    %7 = arith.cmpi eq, %arg2, %c0_i32_3 : i32
    %8 = arith.extui %7 : i1 to i32
    %c0_i32_4 = arith.constant 0 : i32
    %9 = arith.cmpi ne, %8, %c0_i32_4 : i32
    scf.if %9 {
      %cst = arith.constant 0.000000e+00 : f32
      %16 = vector.broadcast %cst : f32 to vector<256x128xf32>
      %c0 = arith.constant 0 : index
      %c0_8 = arith.constant 0 : index
      %17 = vector.load %arg15[%c0, %c0_8] : memref<256x128xf32, #tpu.memory_space<vmem>>, vector<256x128xf32>
      tpu.vector_store %arg15[%c0, %c0_8], %16 {strides = array<i32>} : memref<256x128xf32, #tpu.memory_space<vmem>>, vector<256x128xf32>,
    } else {
    }
    %c0_i32_5 = arith.constant 0 : i32
    %10 = arith.cmpi eq, %arg0, %c0_i32_5 : i32
    %11 = arith.extui %10 : i1 to i32
    %c0_i32_6 = arith.constant 0 : i32
    %12 = arith.cmpi ne, %11, %c0_i32_6 : i32
    scf.if %12 {
      %c0 = arith.constant 0 : index
      %c0_8 = arith.constant 0 : index
      %16 = vector.load %arg4[%c0, %c0_8] : memref<256x8xbf16, #tpu.memory_space<vmem>>, vector<256x8xbf16>
      %c0_9 = arith.constant 0 : index
      %c0_10 = arith.constant 0 : index
      %17 = vector.load %arg5[%c0_9, %c0_10] : memref<8x128xbf16, #tpu.memory_space<vmem>>, vector<8x128xbf16>
      %cst = arith.constant dense<0.000000e+00> : vector<256x128xf32>
      %18 = tpu.matmul %16, %17, %cst {dimension_numbers = #tpu.dot_dimension_numbers<[1], [0], [0], [1], [0, 0, 1, 1], [], []>} : vector<256x8xbf16>, vector<8x128xbf16>, vector<256x128xf32> -> vector<256x128xf32>
      %19 = arith.truncf %18 : vector<256x128xf32> to vector<256x128xbf16>
      %c0_11 = arith.constant 0 : index
      %c0_12 = arith.constant 0 : index
      %20 = vector.load %arg15[%c0_11, %c0_12] : memref<256x128xf32, #tpu.memory_space<vmem>>, vector<256x128xf32>
      %c0_13 = arith.constant 0 : index
      %c0_14 = arith.constant 0 : index
      %21 = vector.load %arg3[%c0_13, %c0_14] : memref<256x256xbf16, #tpu.memory_space<vmem>>, vector<256x256xbf16>
      %cst_15 = arith.constant dense<0.000000e+00> : vector<256x128xf32>
      %22 = tpu.matmul %21, %19, %cst_15 {dimension_numbers = #tpu.dot_dimension_numbers<[1], [0], [0], [1], [0, 0, 1, 1], [], []>} : vector<256x256xbf16>, vector<256x128xbf16>, vector<256x128xf32> -> vector<256x128xf32>
      %23 = arith.addf %20, %22 : vector<256x128xf32>
      %c0_16 = arith.constant 0 : index
      %c0_17 = arith.constant 0 : index
      %24 = vector.load %arg15[%c0_16, %c0_17] : memref<256x128xf32, #tpu.memory_space<vmem>>, vector<256x128xf32>
      tpu.vector_store %arg15[%c0_16, %c0_17], %23 {strides = array<i32>} : memref<256x128xf32, #tpu.memory_space<vmem>>, vector<256x128xf32>,
      %c0_i32_18 = arith.constant 0 : i32
      %25 = arith.cmpi eq, %arg2, %c0_i32_18 : i32
      %26 = arith.extui %25 : i1 to i32
      %c0_i32_19 = arith.constant 0 : i32
      %27 = arith.cmpi ne, %26, %c0_i32_19 : i32
      scf.if %27 {
        %c0_20 = arith.constant 0 : index
        %c0_21 = arith.constant 0 : index
        %28 = vector.load %arg15[%c0_20, %c0_21] : memref<256x128xf32, #tpu.memory_space<vmem>>, vector<256x128xf32>
        %c0_22 = arith.constant 0 : index
        %c0_23 = arith.constant 0 : index
        %29 = vector.load %arg6[%c0_22, %c0_23] : memref<1x128xf32, #tpu.memory_space<vmem>>, vector<1x128xf32>
        %30 = vector.broadcast %29 : vector<1x128xf32> to vector<256x128xf32>
        %31 = arith.addf %28, %30 : vector<256x128xf32>
        %cst_24 = arith.constant 0.000000e+00 : f32
        %32 = vector.broadcast %cst_24 : f32 to vector<256x128xf32>
        %33 = arith.maximumf %31, %32 : vector<256x128xf32>
        %34 = arith.truncf %33 : vector<256x128xf32> to vector<256x128xbf16>
        %c256_i32 = arith.constant 256 : i32
        %35 = arith.muli %arg1, %c256_i32 : i32
        %36 = tpu.assume_multiple %35, 128 : i32
        %c0_25 = arith.constant 0 : index
        %c0_26 = arith.constant 0 : index
        %37 = vector.load %arg7[%c0_25, %c0_26] : memref<128x128xbf16, #tpu.memory_space<vmem>>, vector<128x128xbf16>
        %cst_27 = arith.constant dense<0.000000e+00> : vector<256x128xf32>
        %38 = tpu.matmul %34, %37, %cst_27 {dimension_numbers = #tpu.dot_dimension_numbers<[1], [0], [0], [1], [0, 0, 1, 1], [], []>} : vector<256x128xbf16>, vector<128x128xbf16>, vector<256x128xf32> -> vector<256x128xf32>
        %39 = arith.truncf %38 : vector<256x128xf32> to vector<256x128xbf16>
        %40 = arith.index_cast %36 : i32 to index
        %c0_28 = arith.constant 0 : index
        %41 = vector.load %arg17[%40, %c0_28] : memref<256x128xbf16, #tpu.memory_space<vmem>>, vector<256x128xbf16>
        tpu.vector_store %arg17[%40, %c0_28], %39 {strides = array<i32>} : memref<256x128xbf16, #tpu.memory_space<vmem>>, vector<256x128xbf16>,
      } else {
      }
    } else {
    }
    %c1_i32 = arith.constant 1 : i32
    %13 = arith.cmpi eq, %arg0, %c1_i32 : i32
    %14 = arith.extui %13 : i1 to i32
    %c0_i32_7 = arith.constant 0 : i32
    %15 = arith.cmpi ne, %14, %c0_i32_7 : i32
    scf.if %15 {
      %c256_i32 = arith.constant 256 : i32
      %16 = arith.muli %arg2, %c256_i32 : i32
      %17 = tpu.assume_multiple %16, 128 : i32
      %c0 = arith.constant 0 : index
      %c0_8 = arith.constant 0 : index
      %18 = vector.load %arg15[%c0, %c0_8] : memref<256x128xf32, #tpu.memory_space<vmem>>, vector<256x128xf32>
      %c0_9 = arith.constant 0 : index
      %c0_10 = arith.constant 0 : index
      %19 = vector.load %arg3[%c0_9, %c0_10] : memref<256x256xbf16, #tpu.memory_space<vmem>>, vector<256x256xbf16>
      %20 = arith.index_cast %17 : i32 to index
      %c0_11 = arith.constant 0 : index
      %21 = vector.load %arg17[%20, %c0_11] : memref<256x128xbf16, #tpu.memory_space<vmem>>, vector<256x128xbf16>
      %cst = arith.constant dense<0.000000e+00> : vector<256x128xf32>
      %22 = tpu.matmul %19, %21, %cst {dimension_numbers = #tpu.dot_dimension_numbers<[1], [0], [0], [1], [0, 0, 1, 1], [], []>} : vector<256x256xbf16>, vector<256x128xbf16>, vector<256x128xf32> -> vector<256x128xf32>
      %23 = arith.addf %18, %22 : vector<256x128xf32>
      %c0_12 = arith.constant 0 : index
      %c0_13 = arith.constant 0 : index
      %24 = vector.load %arg15[%c0_12, %c0_13] : memref<256x128xf32, #tpu.memory_space<vmem>>, vector<256x128xf32>
      tpu.vector_store %arg15[%c0_12, %c0_13], %23 {strides = array<i32>} : memref<256x128xf32, #tpu.memory_space<vmem>>, vector<256x128xf32>,
      %c0_i32_14 = arith.constant 0 : i32
      %25 = arith.cmpi eq, %arg2, %c0_i32_14 : i32
      %26 = arith.extui %25 : i1 to i32
      %c0_i32_15 = arith.constant 0 : i32
      %27 = arith.cmpi ne, %26, %c0_i32_15 : i32
      scf.if %27 {
        %c0_19 = arith.constant 0 : index
        %c0_20 = arith.constant 0 : index
        %33 = vector.load %arg15[%c0_19, %c0_20] : memref<256x128xf32, #tpu.memory_space<vmem>>, vector<256x128xf32>
        %c0_21 = arith.constant 0 : index
        %c0_22 = arith.constant 0 : index
        %34 = vector.load %arg8[%c0_21, %c0_22] : memref<1x128xf32, #tpu.memory_space<vmem>>, vector<1x128xf32>
        %35 = vector.broadcast %34 : vector<1x128xf32> to vector<256x128xf32>
        %36 = arith.addf %33, %35 : vector<256x128xf32>
        %cst_23 = arith.constant 0.000000e+00 : f32
        %37 = vector.broadcast %cst_23 : f32 to vector<256x128xf32>
        %38 = arith.maximumf %36, %37 : vector<256x128xf32>
        %39 = arith.truncf %38 : vector<256x128xf32> to vector<256x128xbf16>
        %c0_24 = arith.constant 0 : index
        %c0_25 = arith.constant 0 : index
        %40 = vector.load %arg16[%c0_24, %c0_25] : memref<16x128xf32, #tpu.memory_space<vmem>>, vector<16x128xf32>
        %c0_26 = arith.constant 0 : index
        %c0_27 = arith.constant 0 : index
        %41 = vector.load %arg9[%c0_26, %c0_27] : memref<16x256xbf16, #tpu.memory_space<vmem>>, vector<16x256xbf16>
        %cst_28 = arith.constant dense<0.000000e+00> : vector<16x128xf32>
        %42 = tpu.matmul %41, %39, %cst_28 {dimension_numbers = #tpu.dot_dimension_numbers<[1], [0], [0], [1], [0, 0, 1, 1], [], []>} : vector<16x256xbf16>, vector<256x128xbf16>, vector<16x128xf32> -> vector<16x128xf32>
        %43 = arith.addf %40, %42 : vector<16x128xf32>
        %c0_29 = arith.constant 0 : index
        %c0_30 = arith.constant 0 : index
        %44 = vector.load %arg16[%c0_29, %c0_30] : memref<16x128xf32, #tpu.memory_space<vmem>>, vector<16x128xf32>
        tpu.vector_store %arg16[%c0_29, %c0_30], %43 {strides = array<i32>} : memref<16x128xf32, #tpu.memory_space<vmem>>, vector<16x128xf32>,
      } else {
      }
      %c0_i32_16 = arith.constant 0 : i32
      %28 = arith.cmpi eq, %arg1, %c0_i32_16 : i32
      %c0_i32_17 = arith.constant 0 : i32
      %29 = arith.cmpi eq, %arg2, %c0_i32_17 : i32
      %30 = arith.andi %28, %29 : i1
      %31 = arith.extui %30 : i1 to i32
      %c0_i32_18 = arith.constant 0 : i32
      %32 = arith.cmpi ne, %31, %c0_i32_18 : i32
      scf.if %32 {
        %c0_19 = arith.constant 0 : index
        %c0_20 = arith.constant 0 : index
        %33 = vector.load %arg16[%c0_19, %c0_20] : memref<16x128xf32, #tpu.memory_space<vmem>>, vector<16x128xf32>
        %c0_21 = arith.constant 0 : index
        %c0_22 = arith.constant 0 : index
        %34 = vector.load %arg10[%c0_21, %c0_22] : memref<128x128xf32, #tpu.memory_space<vmem>>, vector<128x128xf32>
        %cst_23 = arith.constant dense<0.000000e+00> : vector<16x128xf32>
        %35 = tpu.matmul %33, %34, %cst_23 {dimension_numbers = #tpu.dot_dimension_numbers<[1], [0], [0], [1], [0, 0, 1, 1], [], []>} : vector<16x128xf32>, vector<128x128xf32>, vector<16x128xf32> -> vector<16x128xf32>
        %c0_24 = arith.constant 0 : index
        %c0_25 = arith.constant 0 : index
        %36 = vector.load %arg11[%c0_24, %c0_25] : memref<1x128xf32, #tpu.memory_space<vmem>>, vector<1x128xf32>
        %37 = vector.broadcast %36 : vector<1x128xf32> to vector<16x128xf32>
        %38 = arith.addf %35, %37 : vector<16x128xf32>
        %cst_26 = arith.constant 0.000000e+00 : f32
        %39 = vector.broadcast %cst_26 : f32 to vector<16x128xf32>
        %40 = arith.maximumf %38, %39 : vector<16x128xf32>
        %c0_27 = arith.constant 0 : index
        %c0_28 = arith.constant 0 : index
        %41 = vector.load %arg12[%c0_27, %c0_28] : memref<128x128xf32, #tpu.memory_space<vmem>>, vector<128x128xf32>
        %cst_29 = arith.constant dense<0.000000e+00> : vector<16x128xf32>
        %42 = tpu.matmul %40, %41, %cst_29 {dimension_numbers = #tpu.dot_dimension_numbers<[1], [0], [0], [1], [0, 0, 1, 1], [], []>} : vector<16x128xf32>, vector<128x128xf32>, vector<16x128xf32> -> vector<16x128xf32>
        %c0_30 = arith.constant 0 : index
        %c0_31 = arith.constant 0 : index
        %43 = vector.load %arg13[%c0_30, %c0_31] : memref<1x128xf32, #tpu.memory_space<vmem>>, vector<1x128xf32>
        %44 = vector.broadcast %43 : vector<1x128xf32> to vector<16x128xf32>
        %45 = arith.addf %42, %44 : vector<16x128xf32>
        %c0_32 = arith.constant 0 : index
        %c0_33 = arith.constant 0 : index
        %46 = vector.load %arg14[%c0_32, %c0_33] : memref<16x128xf32, #tpu.memory_space<vmem>>, vector<16x128xf32>
        tpu.vector_store %arg14[%c0_32, %c0_33], %45 {strides = array<i32>} : memref<16x128xf32, #tpu.memory_space<vmem>>, vector<16x128xf32>,
      } else {
      }
    } else {
    }
    return
  }
  func.func @transform_0(%arg0: i32, %arg1: i32, %arg2: i32) -> (i32, i32) {
    %c0_i32 = arith.constant 0 : i32
    return %arg1, %arg2 : i32, i32
  }
  func.func @transform_1(%arg0: i32, %arg1: i32, %arg2: i32) -> (i32, i32) {
    %c0_i32 = arith.constant 0 : i32
    %c0_i32_0 = arith.constant 0 : i32
    return %arg2, %c0_i32 : i32, i32
  }
  func.func @transform_2(%arg0: i32, %arg1: i32, %arg2: i32) -> (i32, i32) {
    %c0_i32 = arith.constant 0 : i32
    %c0_i32_0 = arith.constant 0 : i32
    %c0_i32_1 = arith.constant 0 : i32
    return %c0_i32, %c0_i32_0 : i32, i32
  }
  func.func @transform_3(%arg0: i32, %arg1: i32, %arg2: i32) -> (i32, i32) {
    %c0_i32 = arith.constant 0 : i32
    %c0_i32_0 = arith.constant 0 : i32
    %c0_i32_1 = arith.constant 0 : i32
    return %c0_i32, %c0_i32_0 : i32, i32
  }
  func.func @transform_4(%arg0: i32, %arg1: i32, %arg2: i32) -> (i32, i32) {
    %c0_i32 = arith.constant 0 : i32
    %c0_i32_0 = arith.constant 0 : i32
    %c0_i32_1 = arith.constant 0 : i32
    return %c0_i32, %c0_i32_0 : i32, i32
  }
  func.func @transform_5(%arg0: i32, %arg1: i32, %arg2: i32) -> (i32, i32) {
    %c0_i32 = arith.constant 0 : i32
    %c0_i32_0 = arith.constant 0 : i32
    %c0_i32_1 = arith.constant 0 : i32
    return %c0_i32, %c0_i32_0 : i32, i32
  }
  func.func @transform_6(%arg0: i32, %arg1: i32, %arg2: i32) -> (i32, i32) {
    %c0_i32 = arith.constant 0 : i32
    %c0_i32_0 = arith.constant 0 : i32
    return %c0_i32, %arg1 : i32, i32
  }
  func.func @transform_7(%arg0: i32, %arg1: i32, %arg2: i32) -> (i32, i32) {
    %c0_i32 = arith.constant 0 : i32
    %c0_i32_0 = arith.constant 0 : i32
    %c0_i32_1 = arith.constant 0 : i32
    return %c0_i32, %c0_i32_0 : i32, i32
  }
  func.func @transform_8(%arg0: i32, %arg1: i32, %arg2: i32) -> (i32, i32) {
    %c0_i32 = arith.constant 0 : i32
    %c0_i32_0 = arith.constant 0 : i32
    %c0_i32_1 = arith.constant 0 : i32
    return %c0_i32, %c0_i32_0 : i32, i32
  }
  func.func @transform_9(%arg0: i32, %arg1: i32, %arg2: i32) -> (i32, i32) {
    %c0_i32 = arith.constant 0 : i32
    %c0_i32_0 = arith.constant 0 : i32
    %c0_i32_1 = arith.constant 0 : i32
    return %c0_i32, %c0_i32_0 : i32, i32
  }
  func.func @transform_10(%arg0: i32, %arg1: i32, %arg2: i32) -> (i32, i32) {
    %c0_i32 = arith.constant 0 : i32
    %c0_i32_0 = arith.constant 0 : i32
    %c0_i32_1 = arith.constant 0 : i32
    return %c0_i32, %c0_i32_0 : i32, i32
  }
  func.func @transform_11(%arg0: i32, %arg1: i32, %arg2: i32) -> (i32, i32) {
    %c0_i32 = arith.constant 0 : i32
    %c0_i32_0 = arith.constant 0 : i32
    %c0_i32_1 = arith.constant 0 : i32
    return %c0_i32, %c0_i32_0 : i32, i32
  }
}

</mosaic_0001>

<bundles_post_ra>
// kernel: tpu_custom_call.1
= control target key start
LH: loop header
LB: loop body
LE: loop exit
PB: predicated region body
PF: predicated region fallthrough
CT: control target
= control target key end

     0   :  { %s4005_s0 = inlined_call_operand.hbm [shape: bf16[256,256], index: 0, kind: input, shape index: {}]   ;;  %s4006_s1 = inlined_call_operand.vmem [shape: bf16[256,8], index: 1, kind: input, shape index: {}]   ;;  %s4007_s2 = inlined_call_operand.vmem [shape: bf16[8,128], index: 2, kind: input, shape index: {}]   ;;  %s4008_s3 = inlined_call_operand.vmem [shape: f32[1,128], index: 3, kind: input, shape index: {}]   ;;  %s4009_s4 = inlined_call_operand.hbm [shape: bf16[128,128], index: 4, kind: input, shape index: {}]   ;;  %s4010_s5 = inlined_call_operand.vmem [shape: f32[1,128], index: 5, kind: input, shape index: {}]   ;;  %s4011_s6 = inlined_call_operand.hbm [shape: bf16[16,256], index: 6, kind: input, shape index: {}]   ;;  %s4012_s7 = inlined_call_operand.vmem [shape: f32[128,128], index: 7, kind: input, shape index: {}]   ;;  %s4013_s8 = inlined_call_operand.vmem [shape: f32[1,128], index: 8, kind: input, shape index: {}]   ;;  %s4014_s9 = inlined_call_operand.hbm [shape: f32[128,128], index: 9, kind: input, shape index: {}]   ;;  %s4015_s10 = inlined_call_operand.vmem [shape: f32[1,128], index: 10, kind: input, shape index: {}]   ;;  %s4016_s11 = inlined_call_operand.hbm [shape: f32[16,128], index: 11, kind: output, shape index: {}]  }
   0x1   :  { %4019 = sst [smem:[#allocation19_spill]] %s4009_s4 }
   0x2   :  { %16 = vsyncpa [#allocation6], 0 }
   0x3   :  { %17 = vsyncpa [#allocation9], 0 }
   0x4   :  { %18 = vsyncpa [#allocation12], 0 }
   0x5   :  { %19 = vsyncpa [#allocation7], 0  ;;  %s3652_s17 = smov 0   ;;  %s3654_s18 = smov 0  }
   0x6   :  { %s3656_s19 = smov 0  }
   0x7 LB: > { %4020 = sst [smem:[#allocation18_spill]] %s3572_s18  ;;  %s4017_s23 = sadd.s32 4294967295, %s3576_s19   ;;  %s3576_s19 = sphi %s3656_s19, %s25_s19   ;;  %s3572_s18 = sphi %s3654_s18, %s4027_s18   ;;  %s3568_s17 = sphi %s3652_s17, %s4026_s17  }
   0x8   : > { %s4021_s4 = sld [smem:[#allocation19_spill]]  ;;  %p2627_p0 = scmp.ge.s32.totalorder %s3576_s19, 1 }
   0x9   : > { %p318_p1 = scmp.lt.s32.totalorder %s3576_s19, 3  ;;  %p3675_p2 = scmp.eq.s32.totalorder %s4017_s23, 0 }
   0xa   : > { %s3578_s26 = smov [#allocation8]   ;;  %s44_s29 = sadd.s32 1, %s3572_s18 }
   0xb   : > { %p3679_p3 = pnand %p2627_p0, %p318_p1  ;;  %s366_s27 = sshll.u32 %s3578_s26, 4  ;;  %s367_s27 = int_to_ptr.vmem [resolvable:$true] %s366_s27 }
   0xc   : > { %p46_p6 = scmp.ge.s32.totalorder %s44_s29, 2  ;;  %s3579_s30 = smov 64  }
   0xd   : > { %p3325_p4 = pneg %p3679_p3  ;;  %s3580_s12 = smov 4  }
   0xe   : > { %s364_s22 = sshll.u32 %s4021_s4, 4  ;;  %s4029_s29 = smov (%p46_p6, %s44_s29), 0  ;;  %s365_s22 = int_to_ptr.hbm [resolvable:$true] %s364_s22 }
   0xf   : > { %p3687_p5 = pnand %p3675_p2, %p3325_p4  ;;  %s335_s15 = sshll.u32 %s4005_s0, 4  ;;  %s336_s15 = int_to_ptr.hbm [resolvable:$true] %s335_s15 }
  0x10   : > { %s3581_s16 = smov [#allocation5]   ;;  %s384_s23 = sshll.u32 %s4011_s6, 4  ;;  %s385_s23 = int_to_ptr.hbm [resolvable:$true] %s384_s23 }
  0x11   : > { %3331 = dma.hbm_to_vmem [thread:$0]  (!%p3687_p5), %s365_s22, 1024, %s367_s27, [#allocation9], %s3579_s30, %s3579_s30, %s3580_s12  }
  0x12   : > { %s337_s20 = sshll.u32 %s3581_s16, 4  ;;  %s3582_s4 = smov 128   ;;  %s338_s20 = int_to_ptr.vmem [resolvable:$true] %s337_s20 }
  0x13   : > { %s3583_s18 = smov 8   ;;  %s3584_s22 = smov [#allocation10]  }
  0x14   : > { %3328 = dma.hbm_to_vmem [thread:$0]  (!%p3687_p5), %s336_s15, 4096, %s338_s20, [#allocation6], %s3582_s4, %s3582_s4, %s3583_s18  }
  0x15   : > { %s386_s27 = sshll.u32 %s3584_s22, 4  ;;  %s404_s13 = sshll.u32 %s4014_s9, 4  ;;  %s387_s27 = int_to_ptr.vmem [resolvable:$true] %s386_s27  ;;  %s405_s13 = int_to_ptr.hbm [resolvable:$true] %s404_s13 }
  0x16   : > { %3334 = dma.hbm_to_vmem [thread:$0]  (!%p3687_p5), %s385_s23, 256, %s387_s27, [#allocation9], %s3582_s4, %s3582_s4, %s3583_s18  }
  0x17   : > { %s3585_s14 = smov [#allocation11]   ;;  %425 = sbr.rel (%p3679_p3) target bundleno = 1804 (0x70c), region = 64 }
  0x18   : > { %s406_s16 = sshll.u32 %s3585_s14, 4  ;;  %s407_s16 = int_to_ptr.vmem [resolvable:$true] %s406_s16 }
  0x19   : > { %3337 = dma.hbm_to_vmem [thread:$0]  (!%p3687_p5), %s405_s13, 2048, %s407_s16, [#allocation12], %s3582_s4, %s3582_s4, %s3583_s18  }
  0x1c   : > { %3551 = dma.done.wait (%p3675_p2), [#allocation6], 4096  }
  0x1d   : > { %3553 = vsyncadd (%p3675_p2), [#allocation6], 4294963200 }
  0x1e   : > { %3555 = dma.done.wait (%p3675_p2), [#allocation9], 1280  }
  0x1f   : > { %3557 = vsyncadd (%p3675_p2), [#allocation9], 4294966016 }
  0x20   : > { %3559 = dma.done.wait (%p3675_p2), [#allocation12], 2048  }
  0x21   : > { %3561 = vsyncadd (%p3675_p2), [#allocation12], 4294965248  ;;  %p486_p7 = scmp.eq.s32.totalorder %s3568_s17, 0 }
  0x22   : > { %v3586_v0 = vmov (%p486_p7), 0   ;;  %v3587_v1 = vmov (%p486_p7), 0.0  }
  0x23   : > { %494 = sbr.rel (!%p486_p7) target bundleno = 69 (0x45), region = 84  ;;  %495 = vst [vmem:[#allocation4] sm:$0xf] (%p486_p7), %v3586_v0 }
  0x24   : > { %496 = vst [vmem:[#allocation4 + $0x4] sm:$0xf] (%p486_p7), %v3586_v0 }
  0x25   : > { %497 = vst [vmem:[#allocation4 + $0x8] sm:$0xf] (%p486_p7), %v3586_v0 }
  0x26   : > { %498 = vst [vmem:[#allocation4 + $0xc] sm:$0xf] (%p486_p7), %v3586_v0 }
  0x27   : > { %499 = vst [vmem:[#allocation4 + $0x10] sm:$0xf] (%p486_p7), %v3586_v0 }
  0x28   : > { %500 = vst [vmem:[#allocation4 + $0x14] sm:$0xf] %v3586_v0 }
  0x29   : > { %501 = vst [vmem:[#allocation4 + $0x18] sm:$0xf] %v3586_v0 }
  0x2a   : > { %502 = vst [vmem:[#allocation4 + $0x1c] sm:$0xf] %v3586_v0 }
  0x2b   : > { %503 = vst [vmem:[#allocation4 + $0x20] sm:$0xf] %v3586_v0 }
  0x2c   : > { %504 = vst [vmem:[#allocation4 + $0x24] sm:$0xf] %v3586_v0 }
  0x2d   : > { %505 = vst [vmem:[#allocation4 + $0x28] sm:$0xf] %v3586_v0 }
  0x2e   : > { %506 = vst [vmem:[#allocation4 + $0x2c] sm:$0xf] %v3586_v0 }
  0x2f   : > { %507 = vst [vmem:[#allocation4 + $0x30] sm:$0xf] %v3586_v0 }
  0x30   : > { %508 = vst [vmem:[#allocation4 + $0x34] sm:$0xf] %v3586_v0 }
  0x31   : > { %509 = vst [vmem:[#allocation4 + $0x38] sm:$0xf] %v3586_v0 }
  0x32   : > { %510 = vst [vmem:[#allocation4 + $0x3c] sm:$0xf] %v3586_v0 }
  0x33   : > { %511 = vst [vmem:[#allocation4 + $0x40] sm:$0xf] %v3586_v0 }
  0x34   : > { %512 = vst [vmem:[#allocation4 + $0x44] sm:$0xf] %v3586_v0 }
  0x35   : > { %513 = vst [vmem:[#allocation4 + $0x48] sm:$0xf] %v3586_v0 }
  0x36   : > { %514 = vst [vmem:[#allocation4 + $0x4c] sm:$0xf] %v3586_v0 }
  0x37   : > { %515 = vst [vmem:[#allocation4 + $0x50] sm:$0xf] %v3586_v0 }
  0x38   : > { %516 = vst [vmem:[#allocation4 + $0x54] sm:$0xf] %v3586_v0 }
  0x39   : > { %517 = vst [vmem:[#allocation4 + $0x58] sm:$0xf] %v3586_v0 }
  0x3a   : > { %518 = vst [vmem:[#allocation4 + $0x5c] sm:$0xf] %v3586_v0 }
  0x3b   : > { %519 = vst [vmem:[#allocation4 + $0x60] sm:$0xf] %v3586_v0 }
  0x3c   : > { %520 = vst [vmem:[#allocation4 + $0x64] sm:$0xf] %v3586_v0 }
  0x3d   : > { %521 = vst [vmem:[#allocation4 + $0x68] sm:$0xf] %v3586_v0 }
  0x3e   : > { %522 = vst [vmem:[#allocation4 + $0x6c] sm:$0xf] %v3586_v0 }
  0x3f   : > { %523 = vst [vmem:[#allocation4 + $0x70] sm:$0xf] %v3586_v0 }
  0x40   : > { %524 = vst [vmem:[#allocation4 + $0x74] sm:$0xf] %v3586_v0 }
  0x41   : > { %525 = vst [vmem:[#allocation4 + $0x78] sm:$0xf] %v3586_v0 }
  0x42   : > { %526 = vst [vmem:[#allocation4 + $0x7c] sm:$0xf] %v3586_v0 }
  0x43   : > { %527 = vst [vmem:[#allocation3] sm:$0xff] %v3587_v1 }
  0x44   : > { %528 = vst [vmem:[#allocation3 + $0x8] sm:$0xff] %v3587_v1 }
  0x45 PF: > { %v3588_v2 = vmov 0.0   ;;  %p2640_p8 = scmp.ne.s32.totalorder %s3568_s17, 0 }
  0x46   : > { %532 = vst [vmem:[#allocation2 + $0xb0] sm:$0xff] %v3588_v2 }
  0x47   : > { %533 = vst [vmem:[#allocation2] sm:$0xff] %v3588_v2 }
  0x48   : > { %534 = vst [vmem:[#allocation2 + $0xd8] sm:$0xff] %v3588_v2 }
  0x49   : > { %535 = vst [vmem:[#allocation2 + $0x18] sm:$0xff] %v3588_v2 }
  0x4a   : > { %536 = vst [vmem:[#allocation2 + $0x50] sm:$0xff] %v3588_v2 }
  0x4b   : > { %537 = vst [vmem:[#allocation2 + $0x68] sm:$0xff] %v3588_v2 }
  0x4c   : > { %538 = vst [vmem:[#allocation2 + $0x30] sm:$0xff] %v3588_v2 }
  0x4d   : > { %539 = vst [vmem:[#allocation2 + $0x48] sm:$0xff] %v3588_v2 }
  0x4e   : > { %540 = vst [vmem:[#allocation2 + $0x80] sm:$0xff] %v3588_v2 }
  0x4f   : > { %541 = vst [vmem:[#allocation2 + $0x88] sm:$0xff] %v3588_v2 }
  0x50   : > { %542 = vst [vmem:[#allocation2 + $0xe8] sm:$0xff] %v3588_v2 }
  0x51   : > { %543 = vst [vmem:[#allocation2 + $0xb8] sm:$0xff] %v3588_v2 }
  0x52   : > { %544 = vst [vmem:[#allocation2 + $0x60] sm:$0xff] %v3588_v2 }
  0x53   : > { %545 = vst [vmem:[#allocation2 + $0xf0] sm:$0xff] %v3588_v2 }
  0x54   : > { %546 = vst [vmem:[#allocation2 + $0x8] sm:$0xff] %v3588_v2 }
  0x55   : > { %547 = vst [vmem:[#allocation2 + $0x78] sm:$0xff] %v3588_v2 }
  0x56   : > { %548 = vst [vmem:[#allocation2 + $0x38] sm:$0xff] %v3588_v2 }
  0x57   : > { %549 = vst [vmem:[#allocation2 + $0x58] sm:$0xff] %v3588_v2 }
  0x58   : > { %550 = vst [vmem:[#allocation2 + $0x40] sm:$0xff] %v3588_v2 }
  0x59   : > { %551 = vst [vmem:[#allocation2 + $0xc8] sm:$0xff] %v3588_v2 }
  0x5a   : > { %552 = vst [vmem:[#allocation2 + $0xe0] sm:$0xff] %v3588_v2 }
  0x5b   : > { %553 = vst [vmem:[#allocation2 + $0x90] sm:$0xff] %v3588_v2 }
  0x5c   : > { %554 = vst [vmem:[#allocation2 + $0x70] sm:$0xff] %v3588_v2 }
  0x5d   : > { %555 = vst [vmem:[#allocation2 + $0xc0] sm:$0xff] %v3588_v2 }
  0x5e   : > { %556 = vst [vmem:[#allocation2 + $0xa8] sm:$0xff] %v3588_v2 }
  0x5f   : > { %557 = vst [vmem:[#allocation2 + $0xd0] sm:$0xff] %v3588_v2 }
  0x60   : > { %558 = vst [vmem:[#allocation2 + $0x10] sm:$0xff] %v3588_v2 }
  0x61   : > { %559 = vst [vmem:[#allocation2 + $0x28] sm:$0xff] %v3588_v2  ;;  %566 = sbr.rel (%p2640_p8) target bundleno = 1047 (0x417), region = 92 }
  0x62   : > { %560 = vst [vmem:[#allocation2 + $0xa0] sm:$0xff] %v3588_v2 }
  0x63   : > { %561 = vst [vmem:[#allocation2 + $0xf8] sm:$0xff] %v3588_v2 }
  0x64   : > { %562 = vst [vmem:[#allocation2 + $0x20] sm:$0xff] %v3588_v2 }
  0x65   : > { %563 = vst [vmem:[#allocation2 + $0x98] sm:$0xff] %v3588_v2 }
  0x66   : > { %v599_v3 = vld [vmem:[%s4007_s2] sm:$0xf]  ;;  %vm729_vm0 = vcmask 1043456   ;;  %vm680_vm1 = vcmask 64512   ;;  %v3089_v6 = vld [vmem:[%s4006_s1 + $0x8] sm:$0xff]  ;;  %v3090_v7 = vld [vmem:[%s4006_s1 + $0x10] sm:$0xff] }
  0x67   : > { %v731_v4 = vsel %vm729_vm0, %v599_v3, 0  ;;  %v3088_v5 = vld [vmem:[%s4006_s1] sm:$0xff]  ;;  %v3091_v8 = vld [vmem:[%s4006_s1 + $0x18] sm:$0xff]  ;;  %v3093_v10 = vld [vmem:[%s4006_s1 + $0x28] sm:$0xff] }
  0x68   : > { %740 = vmatpush.bf16.msra.mxu0 %v731_v4  ;;  %v3092_v9 = vld [vmem:[%s4006_s1 + $0x20] sm:$0xff]  ;;  %v3094_v11 = vld [vmem:[%s4006_s1 + $0x30] sm:$0xff]  ;;  %v3095_v12 = vld [vmem:[%s4006_s1 + $0x38] sm:$0xff] }
  0x69   : > { %v3096_v13 = vld [vmem:[%s4006_s1 + $0x40] sm:$0xff]  ;;  %v3097_v17 = vld [vmem:[%s4006_s1 + $0x48] sm:$0xff]  ;;  %v3098_v21 = vld [vmem:[%s4006_s1 + $0x50] sm:$0xff] }
  0x6a   : > { %v3099_v25 = vld [vmem:[%s4006_s1 + $0x58] sm:$0xff]  ;;  %v3100_v29 = vld [vmem:[%s4006_s1 + $0x60] sm:$0xff]  ;;  %v3101_v32 = vld [vmem:[%s4006_s1 + $0x68] sm:$0xff] }
  0x6b   : > { %2705 = vmatmul.msk.bf16.vlgmr.msra.gmra.mxu0 %vm680_vm1, %v3088_v5  ;;  %v3102_v35 = vld [vmem:[%s4006_s1 + $0x70] sm:$0xff]  ;;  %v3103_v38 = vld [vmem:[%s4006_s1 + $0x78] sm:$0xff] }
  0x6c   : > { %v2723_v0 = vld [vmem:[#allocation5] sm:$0xf]  ;;  %v3105_v1 = vld [vmem:[#allocation5 + $0x4] sm:$0xf0] }
  0x6d   : > { %v2724_v2 = vor.u32 %v3105_v1, %v2723_v0  ;;  %v2795_v0 = vld [vmem:[#allocation5 + $0x90] sm:$0xf]  ;;  %v3123_v1 = vld [vmem:[#allocation5 + $0x94] sm:$0xf0] }
  0x7b   : > { %2706 = vmatmul.msk.bf16.gmra.mxu0 %vm680_vm1, %v3089_v6 }
  0x8b   : > { %2707 = vmatmul.msk.bf16.gmra.mxu0 %vm680_vm1, %v3090_v7  ;;  %v2731_v7 = vld [vmem:[#allocation5 + $0x10] sm:$0xf] }
  0x9b   : > { %2708 = vmatmul.msk.bf16.gmra.mxu0 %vm680_vm1, %v3091_v8  ;;  %v3107_v8 = vld [vmem:[#allocation5 + $0x14] sm:$0xf0] }
  0xab   : > { %2709 = vmatmul.msk.bf16.gmra.mxu0 %vm680_vm1, %v3092_v9  ;;  %v2732_v9 = vor.u32 %v3107_v8, %v2731_v7  ;;  %v3120_v7 = vld [vmem:[#allocation5 + $0x84] sm:$0xf]  ;;  %v2789_v8 = vld [vmem:[#allocation5 + $0x88] sm:$0xf0] }
  0xbb   : > { %2710 = vmatmul.msk.bf16.gmra.mxu0 %vm680_vm1, %v3093_v10 }
  0xcb   : > { %2711 = vmatmul.msk.bf16.gmra.mxu0 %vm680_vm1, %v3094_v11  ;;  %v2739_v11 = vld [vmem:[#allocation5 + $0x20] sm:$0xf] }
  0xdb   : > { %2712 = vmatmul.msk.bf16.gmra.mxu0 %vm680_vm1, %v3095_v12  ;;  %v3109_v12 = vld [vmem:[#allocation5 + $0x24] sm:$0xf0] }
  0xe8   : > { %v742_v14 = vpop.f32.mrf.mxu0 }
  0xeb   : > { %2713 = vmatmul.msk.bf16.gmra.mxu0 %vm680_vm1, %v3096_v13  ;;  %v3104_v13 = vld [vmem:[#allocation5 + $0x4] sm:$0xf] }
  0xf0   : > { %v744_v15 = vpop.f32.mrf.mxu0 }
  0xf1   : > { %v822_v16 = vpack.c.bf16 %v744_v15, %v742_v14  ;;  %v2725_v14 = vld [vmem:[#allocation5 + $0x8] sm:$0xf0]  ;;  %v2740_v15 = vor.u32 %v3109_v12, %v2739_v11  ;;  %v3125_v11 = vld [vmem:[#allocation5 + $0xa4] sm:$0xf0]  ;;  %v2792_v12 = vor.u32 %v3120_v7, %v2789_v8 }
  0xf8   : > { %v747_v18 = vpop.f32.mrf.mxu0 }
  0xfb   : > { %2714 = vmatmul.msk.bf16.gmra.mxu0 %vm680_vm1, %v3097_v17  ;;  %v2747_v17 = vld [vmem:[#allocation5 + $0x30] sm:$0xf] }
 0x100   : > { %v749_v19 = vpop.f32.mrf.mxu0 }
 0x101   : > { %v823_v20 = vpack.c.bf16 %v749_v19, %v747_v18  ;;  %v3111_v18 = vld [vmem:[#allocation5 + $0x34] sm:$0xf0]  ;;  %v3106_v19 = vld [vmem:[#allocation5 + $0x14] sm:$0xf] }
 0x108   : > { %v752_v22 = vpop.f32.mrf.mxu0 }
 0x10b   : > { %2715 = vmatmul.msk.bf16.gmra.mxu0 %vm680_vm1, %v3098_v21  ;;  %v2748_v21 = vor.u32 %v3111_v18, %v2747_v17 }
 0x110   : > { %v754_v23 = vpop.f32.mrf.mxu0 }
 0x111   : > { %v824_v24 = vpack.c.bf16 %v754_v23, %v752_v22  ;;  %v2755_v23 = vld [vmem:[#allocation5 + $0x40] sm:$0xf] }
 0x118   : > { %v757_v26 = vpop.f32.mrf.mxu0 }
 0x11b   : > { %2716 = vmatmul.msk.bf16.gmra.mxu0 %vm680_vm1, %v3099_v25  ;;  %v3108_v25 = vld [vmem:[#allocation5 + $0x24] sm:$0xf] }
 0x120   : > { %v759_v27 = vpop.f32.mrf.mxu0 }
 0x121   : > { %v825_v28 = vpack.c.bf16 %v759_v27, %v757_v26  ;;  %v2741_v26 = vld [vmem:[#allocation5 + $0x28] sm:$0xf0] }
 0x128   : > { %v762_v30 = vpop.f32.mrf.mxu0 }
 0x12b   : > { %2717 = vmatmul.msk.bf16.gmra.mxu0 %vm680_vm1, %v3100_v29  ;;  %v2763_v29 = vld [vmem:[#allocation5 + $0x50] sm:$0xf] }
 0x130   : > { %v764_v31 = vpop.f32.mrf.mxu0 }
 0x131   : > { %v826_v45 = vpack.c.bf16 %v764_v31, %v762_v30  ;;  %v3115_v30 = vld [vmem:[#allocation5 + $0x54] sm:$0xf0]  ;;  %v3110_v31 = vld [vmem:[#allocation5 + $0x34] sm:$0xf] }
 0x138   : > { %v767_v33 = vpop.f32.mrf.mxu0 }
 0x13b   : > { %2718 = vmatmul.msk.bf16.gmra.mxu0 %vm680_vm1, %v3101_v32  ;;  %v2749_v32 = vld [vmem:[#allocation5 + $0x38] sm:$0xf0] }
 0x140   : > { %v769_v34 = vpop.f32.mrf.mxu0 }
 0x141   : > { %v827_v44 = vpack.c.bf16 %v769_v34, %v767_v33  ;;  %v2764_v33 = vor.u32 %v3115_v30, %v2763_v29  ;;  %v2752_v34 = vor.u32 %v3110_v31, %v2749_v32 }
 0x148   : > { %v772_v36 = vpop.f32.mrf.mxu0 }
 0x14b   : > { %2719 = vmatmul.msk.bf16.gmra.mxu0 %vm680_vm1, %v3102_v35  ;;  %v2771_v35 = vld [vmem:[#allocation5 + $0x60] sm:$0xf] }
 0x150   : > { %v774_v37 = vpop.f32.mrf.mxu0 }
 0x151   : > { %v828_v42 = vpack.c.bf16 %v774_v37, %v772_v36  ;;  %v3117_v36 = vld [vmem:[#allocation5 + $0x64] sm:$0xf0]  ;;  %v3112_v37 = vld [vmem:[#allocation5 + $0x44] sm:$0xf] }
 0x158   : > { %v777_v39 = vpop.f32.mrf.mxu0 }
 0x15b   : > { %2720 = vmatmul.msk.bf16.gmra.mxu0 %vm680_vm1, %v3103_v38  ;;  %v2757_v38 = vld [vmem:[#allocation5 + $0x48] sm:$0xf0] }
 0x160   : > { %v779_v40 = vpop.f32.mrf.mxu0 }
 0x161   : > { %v829_v41 = vpack.c.bf16 %v779_v40, %v777_v39  ;;  %v2772_v39 = vor.u32 %v3117_v36, %v2771_v35  ;;  %v2760_v40 = vor.u32 %v3112_v37, %v2757_v38  ;;  %v840_v35 = vld [vmem:[#allocation2 + $0xd8] sm:$0xff] }
 0x163   : > { %1062 = vmatpush.bf16.msra.mxu1 %v829_v41  ;;  %v2779_v41 = vld [vmem:[#allocation5 + $0x70] sm:$0xf] }
 0x167   : > { %1063 = vmatpush.bf16.msra.mxu1 %v828_v42  ;;  %v3119_v42 = vld [vmem:[#allocation5 + $0x74] sm:$0xf0] }
 0x168   : > { %v782_v43 = vpop.f32.mrf.mxu0 }
 0x16b   : > { %1064 = vmatpush.bf16.msra.mxu1 %v827_v44  ;;  %v2765_v44 = vld [vmem:[#allocation5 + $0x58] sm:$0xf0] }
 0x16f   : > { %1065 = vmatpush.bf16.msra.mxu1 %v826_v45  ;;  %v2780_v45 = vor.u32 %v3119_v42, %v2779_v41  ;;  %v3124_v41 = vld [vmem:[#allocation5 + $0xa4] sm:$0xf]  ;;  %v2805_v42 = vld [vmem:[#allocation5 + $0xa8] sm:$0xf0] }
 0x170   : > { %v784_v46 = vpop.f32.mrf.mxu0 }
 0x171   : > { %v830_v47 = vpack.c.bf16 %v784_v46, %v782_v43  ;;  %v3114_v43 = vld [vmem:[#allocation5 + $0x54] sm:$0xf] }
 0x172   : > { %v2768_v46 = vor.u32 %v3114_v43, %v2765_v44  ;;  %v841_v43 = vld [vmem:[#allocation2 + $0x18] sm:$0xff] }
 0x173   : > { %1066 = vmatpush.bf16.msra.mxu1 %v825_v28  ;;  %v2744_v28 = vor.u32 %v3108_v25, %v2741_v26  ;;  %v2811_v25 = vld [vmem:[#allocation5 + $0xb0] sm:$0xf]  ;;  %v3127_v26 = vld [vmem:[#allocation5 + $0xb4] sm:$0xf0] }
 0x174   : > { %v2812_v29 = vor.u32 %v3127_v26, %v2811_v25  ;;  %v2835_v25 = vld [vmem:[#allocation5 + $0xe0] sm:$0xf]  ;;  %v3133_v26 = vld [vmem:[#allocation5 + $0xe4] sm:$0xf0] }
 0x177   : > { %1067 = vmatpush.bf16.msra.mxu1 %v824_v24  ;;  %v3113_v24 = vld [vmem:[#allocation5 + $0x44] sm:$0xf0] }
 0x178   : > { %v787_v48 = vpop.f32.mrf.mxu0  ;;  %v2756_v27 = vor.u32 %v3113_v24, %v2755_v23 }
 0x17b   : > { %1068 = vmatpush.bf16.msra.mxu1 %v823_v20  ;;  %v2733_v20 = vld [vmem:[#allocation5 + $0x18] sm:$0xf0] }
 0x17c   : > { %v2736_v22 = vor.u32 %v3106_v19, %v2733_v20  ;;  %v3122_v19 = vld [vmem:[#allocation5 + $0x94] sm:$0xf]  ;;  %v2797_v20 = vld [vmem:[#allocation5 + $0x98] sm:$0xf0] }
 0x17f   : > { %1069 = vmatpush.bf16.msra.mxu1 %v822_v16  ;;  %v2728_v16 = vor.u32 %v3104_v13, %v2725_v14  ;;  %v838_v14 = vld [vmem:[#allocation2 + $0xb0] sm:$0xff] }
 0x180   : > { %v789_v49 = vpop.f32.mrf.mxu0 }
 0x181   : > { %v831_v50 = vpack.c.bf16 %v789_v49, %v787_v48  ;;  %v2787_v48 = vld [vmem:[#allocation5 + $0x80] sm:$0xf]  ;;  %v3121_v49 = vld [vmem:[#allocation5 + $0x84] sm:$0xf0] }
 0x182   : > { %1070 = vmatmul.bf16.vlgmr.msra.gmra.mxu1 %v2724_v2 }
 0x188   : > { %v792_v51 = vpop.f32.mrf.mxu0 }
 0x190   : > { %v794_v52 = vpop.f32.mrf.mxu0 }
 0x191   : > { %v832_v53 = vpack.c.bf16 %v794_v52, %v792_v51  ;;  %v2773_v51 = vld [vmem:[#allocation5 + $0x68] sm:$0xf0]  ;;  %v3142_v52 = vld [vmem:[#allocation8 + $0x30] sm:$0xff] }
 0x192   : > { %1075 = vmatmul.bf16.gmra.mxu1 %v2732_v9 }
 0x198   : > { %v797_v54 = vpop.f32.mrf.mxu0 }
 0x1a0   : > { %v799_v55 = vpop.f32.mrf.mxu0 }
 0x1a1   : > { %v833_v56 = vpack.c.bf16 %v799_v55, %v797_v54 }
 0x1a2   : > { %1080 = vmatmul.bf16.gmra.mxu1 %v2740_v15 }
 0x1a8   : > { %v802_v57 = vpop.f32.mrf.mxu0 }
 0x1b0   : > { %v804_v58 = vpop.f32.mrf.mxu0 }
 0x1b1   : > { %v834_v10 = vpack.c.bf16 %v804_v58, %v802_v57  ;;  %v3140_v57 = vld [vmem:[#allocation8 + $0x20] sm:$0xff] }
 0x1b2   : > { %1085 = vmatmul.bf16.gmra.mxu1 %v2748_v21  ;;  %v3799_v21 = vld [vmem:[%s4008_s3] ss:$0 sm:$0xff] }
 0x1b8   : > { %v807_v59 = vpop.f32.mrf.mxu0 }
 0x1c0   : > { %v809_v60 = vpop.f32.mrf.mxu0 }
 0x1c1   : > { %v835_v6 = vpack.c.bf16 %v809_v60, %v807_v59  ;;  %v3139_v59 = vld [vmem:[#allocation8 + $0x18] sm:$0xff]  ;;  %v3118_v60 = vld [vmem:[#allocation5 + $0x74] sm:$0xf] }
 0x1c2   : > { %1090 = vmatmul.bf16.gmra.mxu1 %v2756_v27 }
 0x1c8   : > { %v812_v61 = vpop.f32.mrf.mxu0 }
 0x1d0   : > { %v814_v62 = vpop.f32.mrf.mxu0 }
 0x1d1   : > { %v836_v5 = vpack.c.bf16 %v814_v62, %v812_v61  ;;  %v2781_v61 = vld [vmem:[#allocation5 + $0x78] sm:$0xf0]  ;;  %v3138_v62 = vld [vmem:[#allocation8 + $0x10] sm:$0xff] }
 0x1d2   : > { %1095 = vmatmul.bf16.gmra.mxu1 %v2764_v33  ;;  %v2784_v2 = vor.u32 %v3118_v60, %v2781_v61 }
 0x1d8   : > { %v817_v63 = vpop.f32.mrf.mxu0 }
 0x1e0   : > { %v819_v3 = vpop.f32.mrf.mxu0 }
 0x1e1   : > { %v837_v4 = vpack.c.bf16 %v819_v3, %v817_v63  ;;  %v2796_v3 = vor.u32 %v3123_v1, %v2795_v0  ;;  %v843_v0 = vld [vmem:[#allocation2 + $0x68] sm:$0xff] }
 0x1e2   : > { %1100 = vmatmul.bf16.gmra.mxu1 %v2772_v39 }
 0x1e3   : > { %1151 = vmatpush.bf16.msra.mxu2 %v837_v4  ;;  %v3137_v4 = vld [vmem:[#allocation8 + $0x8] sm:$0xff] }
 0x1e7   : > { %1152 = vmatpush.bf16.msra.mxu2 %v836_v5  ;;  %v3136_v5 = vld [vmem:[#allocation8] sm:$0xff] }
 0x1eb   : > { %1153 = vmatpush.bf16.msra.mxu2 %v835_v6 }
 0x1ef   : > { %1154 = vmatpush.bf16.msra.mxu2 %v834_v10  ;;  %v2803_v10 = vld [vmem:[#allocation5 + $0xa0] sm:$0xf] }
 0x1f0   : > { %v2804_v13 = vor.u32 %v3125_v11, %v2803_v10 }
 0x1f2   : > { %1105 = vmatmul.bf16.gmra.mxu1 %v2780_v45 }
 0x1f3   : > { %1155 = vmatpush.bf16.msra.mxu2 %v833_v56  ;;  %v3141_v56 = vld [vmem:[#allocation8 + $0x28] sm:$0xff] }
 0x1f7   : > { %1156 = vmatpush.bf16.msra.mxu2 %v832_v53  ;;  %v2788_v53 = vor.u32 %v3121_v49, %v2787_v48  ;;  %v2808_v49 = vor.u32 %v3124_v41, %v2805_v42  ;;  %v3130_v41 = vld [vmem:[#allocation5 + $0xd4] sm:$0xf]  ;;  %v2829_v42 = vld [vmem:[#allocation5 + $0xd8] sm:$0xf0] }
 0x1fb   : > { %1157 = vmatpush.bf16.msra.mxu2 %v831_v50  ;;  %v3116_v50 = vld [vmem:[#allocation5 + $0x64] sm:$0xf] }
 0x1fc   : > { %v2776_v55 = vor.u32 %v3116_v50, %v2773_v51 }
 0x1ff   : > { %1158 = vmatpush.bf16.msra.mxu2 %v830_v47  ;;  %v3143_v47 = vld [vmem:[#allocation8 + $0x38] sm:$0xff]  ;;  %v1071_v54 = vpop.f32.mrf.mxu1 }
 0x200   : > { %1488 = vmatpush.bf16.msra.mxu3 %v3143_v47  ;;  %v3129_v47 = vld [vmem:[#allocation5 + $0xc4] sm:$0xf0] }
 0x202   : > { %1159 = vmatmul.bf16.vlgmr.msra.gmra.mxu2 %v2728_v16  ;;  %1110 = vmatmul.bf16.gmra.mxu1 %v2788_v53 }
 0x204   : > { %1489 = vmatpush.bf16.msra.mxu3 %v3142_v52 }
 0x207   : > { %v1073_v58 = vpop.f32.mrf.mxu1 }
 0x208   : > { %1490 = vmatpush.bf16.msra.mxu3 %v3141_v56  ;;  %v842_v56 = vld [vmem:[#allocation2 + $0x50] sm:$0xff] }
 0x20c   : > { %1491 = vmatpush.bf16.msra.mxu3 %v3140_v57 }
 0x20f   : > { %v1076_v63 = vpop.f32.mrf.mxu1 }
 0x210   : > { %1492 = vmatpush.bf16.msra.mxu3 %v3139_v59 }
 0x212   : > { %1164 = vmatmul.bf16.gmra.mxu2 %v2736_v22  ;;  %1115 = vmatmul.bf16.gmra.mxu1 %v2796_v3  ;;  %v839_v22 = vld [vmem:[#allocation2] sm:$0xff] }
 0x213   : > { %v2827_v3 = vld [vmem:[#allocation5 + $0xd0] sm:$0xf] }
 0x214   : > { %1493 = vmatpush.bf16.msra.mxu3 %v3138_v62  ;;  %v3126_v62 = vld [vmem:[#allocation5 + $0xb4] sm:$0xf] }
 0x217   : > { %v1078_v6 = vpop.f32.mrf.mxu1 }
 0x218   : > { %1494 = vmatpush.bf16.msra.mxu3 %v3137_v4  ;;  %v3131_v4 = vld [vmem:[#allocation5 + $0xd4] sm:$0xf0] }
 0x219   : > { %v2828_v7 = vor.u32 %v3131_v4, %v2827_v3 }
 0x21c   : > { %1495 = vmatpush.bf16.msra.mxu3 %v3136_v5 }
 0x21f   : > { %v1081_v9 = vpop.f32.mrf.mxu1 }
 0x222   : > { %1169 = vmatmul.bf16.gmra.mxu2 %v2744_v28  ;;  %1120 = vmatmul.bf16.gmra.mxu1 %v2804_v13  ;;  %v2800_v28 = vor.u32 %v3122_v19, %v2797_v20  ;;  %v844_v13 = vld [vmem:[#allocation2 + $0x30] sm:$0xff]  ;;  %v2821_v20 = vld [vmem:[#allocation5 + $0xc8] sm:$0xf0] }
 0x227   : > { %v3794_v16 = vpop.f32.mrf.mxu1 }
 0x22f   : > { %v3801_v24 = vpop.f32.mrf.mxu1 }
 0x232   : > { %1174 = vmatmul.bf16.gmra.mxu2 %v2752_v34  ;;  %1125 = vmatmul.bf16.gmra.mxu1 %v2812_v29  ;;  %v2836_v29 = vor.u32 %v3133_v26, %v2835_v25 }
 0x237   : > { %v3805_v37 = vpop.f32.mrf.mxu1 }
 0x23f   : > { %v3807_v45 = vpop.f32.mrf.mxu1 }
 0x242   : > { %1179 = vmatmul.bf16.gmra.mxu2 %v2760_v40 }
 0x252   : > { %1184 = vmatmul.bf16.gmra.mxu2 %v2768_v46  ;;  %v2819_v46 = vld [vmem:[#allocation5 + $0xc0] sm:$0xf] }
 0x253   : > { %v2820_v50 = vor.u32 %v3129_v47, %v2819_v46  ;;  %v2843_v46 = vld [vmem:[#allocation5 + $0xf0] sm:$0xf]  ;;  %v3135_v47 = vld [vmem:[#allocation5 + $0xf4] sm:$0xf0] }
 0x255   : > { %1130 = vmatmul.bf16.gmra.mxu1 %v2820_v50  ;;  %v2844_v50 = vor.u32 %v3135_v47, %v2843_v46 }
 0x262   : > { %1189 = vmatmul.bf16.gmra.mxu2 %v2776_v55 }
 0x265   : > { %1135 = vmatmul.bf16.gmra.mxu1 %v2828_v7 }
 0x272   : > { %1194 = vmatmul.bf16.gmra.mxu2 %v2784_v2 }
 0x275   : > { %1140 = vmatmul.bf16.gmra.mxu1 %v2836_v29  ;;  %v852_v29 = vld [vmem:[#allocation2 + $0x8] sm:$0xff] }
 0x282   : > { %1199 = vmatmul.bf16.gmra.mxu2 %v2792_v12 }
 0x285   : > { %v1160_v15 = vpop.f32.mrf.mxu2  ;;  %1145 = vmatmul.bf16.gmra.mxu1 %v2844_v50 }
 0x286   : > { %v1161_v17 = vadd.f32 %v1160_v15, %v1071_v54 }
 0x288   : > { %v1240_v18 = vadd.f32 %v1161_v17, %v838_v14 }
 0x28a   : > { %1272 = vst [vmem:[#allocation2 + $0xb0] sm:$0xff] %v1240_v18  ;;  %v1343_v31 = vadd.f32 %v3799_v21, %v1240_v18 }
 0x28c   : > { %v1375_v33 = vmax.f32 %v1343_v31, 0.0 }
 0x28d   : > { %v1162_v23 = vpop.f32.mrf.mxu2 }
 0x28e   : > { %v1163_v27 = vadd.f32 %v1162_v23, %v1073_v58  ;;  %v3811_v58 = vpop.f32.mrf.mxu1 }
 0x290   : > { %v1241_v30 = vadd.f32 %v1163_v27, %v839_v22  ;;  %v845_v22 = vld [vmem:[#allocation2 + $0x48] sm:$0xff] }
 0x292   : > { %1273 = vst [vmem:[#allocation2] sm:$0xff] %v1241_v30  ;;  %1204 = vmatmul.bf16.gmra.mxu2 %v2800_v28  ;;  %v1344_v32 = vadd.f32 %v3799_v21, %v1241_v30 }
 0x294   : > { %v1376_v34 = vmax.f32 %v1344_v32, 0.0 }
 0x295   : > { %v1165_v36 = vpop.f32.mrf.mxu2 }
 0x296   : > { %v1166_v38 = vadd.f32 %v1165_v36, %v1076_v63  ;;  %v1407_v39 = vpack.c.bf16 %v1376_v34, %v1375_v33  ;;  %v2813_v63 = vld [vmem:[#allocation5 + $0xb8] sm:$0xf0]  ;;  %v3813_v2 = vpop.f32.mrf.mxu1 }
 0x298   : > { %v1242_v40 = vadd.f32 %v1166_v38, %v840_v35  ;;  %1496 = vmatmul.bf16.vlgmr.msra.gmra.mxu3 %v1407_v39  ;;  %v846_v35 = vld [vmem:[#allocation2 + $0x80] sm:$0xff] }
 0x29a   : > { %1274 = vst [vmem:[#allocation2 + $0xd8] sm:$0xff] %v1242_v40  ;;  %v1345_v52 = vadd.f32 %v3799_v21, %v1242_v40 }
 0x29c   : > { %v1377_v54 = vmax.f32 %v1345_v52, 0.0 }
 0x29d   : > { %v1167_v44 = vpop.f32.mrf.mxu2 }
 0x29e   : > { %v1168_v48 = vadd.f32 %v1167_v44, %v1078_v6  ;;  %v2816_v6 = vor.u32 %v3126_v62, %v2813_v63  ;;  %v1098_v15 = vpop.f32.mrf.mxu1  ;;  %v2837_v62 = vld [vmem:[#allocation5 + $0xe8] sm:$0xf0] }
 0x29f   : > { %v849_v63 = vld [vmem:[#allocation2 + $0xb8] sm:$0xff] }
 0x2a0   : > { %v1243_v51 = vadd.f32 %v1168_v48, %v841_v43  ;;  %v847_v43 = vld [vmem:[#allocation2 + $0x88] sm:$0xff] }
 0x2a2   : > { %1275 = vst [vmem:[#allocation2 + $0x18] sm:$0xff] %v1243_v51  ;;  %1209 = vmatmul.bf16.gmra.mxu2 %v2808_v49  ;;  %v1346_v53 = vadd.f32 %v3799_v21, %v1243_v51  ;;  %v2832_v49 = vor.u32 %v3130_v41, %v2829_v42  ;;  %v854_v42 = vld [vmem:[#allocation2 + $0x38] sm:$0xff] }
 0x2a4   : > { %v1378_v55 = vmax.f32 %v1346_v53, 0.0 }
 0x2a5   : > { %v1170_v57 = vpop.f32.mrf.mxu2 }
 0x2a6   : > { %v1171_v59 = vadd.f32 %v1170_v57, %v1081_v9  ;;  %v1408_v60 = vpack.c.bf16 %v1378_v55, %v1377_v54  ;;  %v1101_v30 = vpop.f32.mrf.mxu1 }
 0x2a8   : > { %v1244_v61 = vadd.f32 %v1171_v59, %v842_v56  ;;  %1501 = vmatmul.bf16.gmra.mxu3 %v1408_v60  ;;  %v848_v56 = vld [vmem:[#allocation2 + $0xe8] sm:$0xff] }
 0x2aa   : > { %1276 = vst [vmem:[#allocation2 + $0x50] sm:$0xff] %v1244_v61  ;;  %v1347_v10 = vadd.f32 %v3799_v21, %v1244_v61 }
 0x2ac   : > { %v1379_v11 = vmax.f32 %v1347_v10, 0.0  ;;  %v850_v10 = vld [vmem:[#allocation2 + $0x60] sm:$0xff] }
 0x2ad   : > { %v1172_v1 = vpop.f32.mrf.mxu2 }
 0x2ae   : > { %v1173_v5 = vadd.f32 %v1172_v1, %v3794_v16  ;;  %v3128_v16 = vld [vmem:[#allocation5 + $0xc4] sm:$0xf] }
 0x2af   : > { %v2824_v28 = vor.u32 %v3128_v16, %v2821_v20 }
 0x2b0   : > { %v1245_v8 = vadd.f32 %v1173_v5, %v843_v0 }
 0x2b2   : > { %1277 = vst [vmem:[#allocation2 + $0x68] sm:$0xff] %v1245_v8  ;;  %1214 = vmatmul.bf16.gmra.mxu2 %v2816_v6  ;;  %v1348_v9 = vadd.f32 %v3799_v21, %v1245_v8 }
 0x2b4   : > { %v1380_v12 = vmax.f32 %v1348_v9, 0.0 }
 0x2b5   : > { %v1175_v14 = vpop.f32.mrf.mxu2 }
 0x2b6   : > { %v1176_v17 = vadd.f32 %v1175_v14, %v3801_v24  ;;  %v1409_v18 = vpack.c.bf16 %v1380_v12, %v1379_v11 }
 0x2b8   : > { %v1246_v19 = vadd.f32 %v1176_v17, %v844_v13  ;;  %1506 = vmatmul.bf16.gmra.mxu3 %v1409_v18  ;;  %v3134_v17 = vld [vmem:[#allocation5 + $0xf4] sm:$0xf]  ;;  %v851_v18 = vld [vmem:[#allocation2 + $0xf0] sm:$0xff] }
 0x2ba   : > { %1278 = vst [vmem:[#allocation2 + $0x30] sm:$0xff] %v1246_v19  ;;  %v1349_v32 = vadd.f32 %v3799_v21, %v1246_v19 }
 0x2bc   : > { %v1381_v33 = vmax.f32 %v1349_v32, 0.0 }
 0x2bd   : > { %v1177_v23 = vpop.f32.mrf.mxu2 }
 0x2be   : > { %v1178_v27 = vadd.f32 %v1177_v23, %v3805_v37  ;;  %v1103_v37 = vpop.f32.mrf.mxu1 }
 0x2c0   : > { %v1247_v31 = vadd.f32 %v1178_v27, %v845_v22 }
 0x2c2   : > { %1279 = vst [vmem:[#allocation2 + $0x48] sm:$0xff] %v1247_v31  ;;  %1219 = vmatmul.bf16.gmra.mxu2 %v2824_v28  ;;  %v1350_v24 = vadd.f32 %v3799_v21, %v1247_v31 }
 0x2c4   : > { %v1382_v34 = vmax.f32 %v1350_v24, 0.0 }
 0x2c5   : > { %v1180_v36 = vpop.f32.mrf.mxu2 }
 0x2c6   : > { %v1181_v38 = vadd.f32 %v1180_v36, %v3807_v45  ;;  %v1410_v39 = vpack.c.bf16 %v1382_v34, %v1381_v33  ;;  %v1106_v53 = vpop.f32.mrf.mxu1  ;;  %v853_v34 = vld [vmem:[#allocation2 + $0x78] sm:$0xff] }
 0x2c8   : > { %v1248_v40 = vadd.f32 %v1181_v38, %v846_v35  ;;  %1511 = vmatmul.bf16.gmra.mxu3 %v1410_v39 }
 0x2ca   : > { %1280 = vst [vmem:[#allocation2 + $0x80] sm:$0xff] %v1248_v40  ;;  %v1351_v52 = vadd.f32 %v3799_v21, %v1248_v40 }
 0x2cc   : > { %v1383_v54 = vmax.f32 %v1351_v52, 0.0 }
 0x2cd   : > { %v1182_v44 = vpop.f32.mrf.mxu2 }
 0x2ce   : > { %v1183_v48 = vadd.f32 %v1182_v44, %v3811_v58  ;;  %v3132_v58 = vld [vmem:[#allocation5 + $0xe4] sm:$0xf]  ;;  %v1108_v1 = vpop.f32.mrf.mxu1 }
 0x2cf   : > { %v2840_v4 = vor.u32 %v3132_v58, %v2837_v62 }
 0x2d0   : > { %v1249_v51 = vadd.f32 %v1183_v48, %v847_v43 }
 0x2d2   : > { %1281 = vst [vmem:[#allocation2 + $0x88] sm:$0xff] %v1249_v51  ;;  %1224 = vmatmul.bf16.gmra.mxu2 %v2832_v49  ;;  %v1352_v45 = vadd.f32 %v3799_v21, %v1249_v51  ;;  %v855_v49 = vld [vmem:[#allocation2 + $0x58] sm:$0xff] }
 0x2d4   : > { %v1384_v55 = vmax.f32 %v1352_v45, 0.0 }
 0x2d5   : > { %v1185_v57 = vpop.f32.mrf.mxu2 }
 0x2d6   : > { %v1186_v59 = vadd.f32 %v1185_v57, %v3813_v2  ;;  %v1411_v60 = vpack.c.bf16 %v1384_v55, %v1383_v54  ;;  %v1111_v13 = vpop.f32.mrf.mxu1  ;;  %v856_v57 = vld [vmem:[#allocation2 + $0x40] sm:$0xff] }
 0x2d8   : > { %v1250_v61 = vadd.f32 %v1186_v59, %v848_v56  ;;  %1516 = vmatmul.bf16.gmra.mxu3 %v1411_v60 }
 0x2da   : > { %1282 = vst [vmem:[#allocation2 + $0xe8] sm:$0xff] %v1250_v61  ;;  %v1353_v6 = vadd.f32 %v3799_v21, %v1250_v61 }
 0x2dc   : > { %v1385_v8 = vmax.f32 %v1353_v6, 0.0 }
 0x2dd   : > { %v1187_v0 = vpop.f32.mrf.mxu2 }
 0x2de   : > { %v1188_v3 = vadd.f32 %v1187_v0, %v1098_v15  ;;  %v2845_v15 = vld [vmem:[#allocation5 + $0xf8] sm:$0xf0]  ;;  %v1113_v25 = vpop.f32.mrf.mxu1 }
 0x2df   : > { %v2848_v20 = vor.u32 %v3134_v17, %v2845_v15  ;;  %v857_v0 = vld [vmem:[#allocation2 + $0xc8] sm:$0xff] }
 0x2e0   : > { %v1251_v5 = vadd.f32 %v1188_v3, %v849_v63 }
 0x2e2   : > { %1283 = vst [vmem:[#allocation2 + $0xb8] sm:$0xff] %v1251_v5  ;;  %1229 = vmatmul.bf16.gmra.mxu2 %v2840_v4  ;;  %v1354_v7 = vadd.f32 %v3799_v21, %v1251_v5 }
 0x2e4   : > { %v1386_v2 = vmax.f32 %v1354_v7, 0.0 }
 0x2e5   : > { %v1190_v9 = vpop.f32.mrf.mxu2 }
 0x2e6   : > { %v1191_v11 = vadd.f32 %v1190_v9, %v1101_v30  ;;  %v1412_v12 = vpack.c.bf16 %v1386_v2, %v1385_v8  ;;  %v1116_v33 = vpop.f32.mrf.mxu1 }
 0x2e8   : > { %v1252_v14 = vadd.f32 %v1191_v11, %v850_v10  ;;  %1521 = vmatmul.bf16.gmra.mxu3 %v1412_v12  ;;  %v858_v11 = vld [vmem:[#allocation2 + $0xe0] sm:$0xff] }
 0x2ea   : > { %1284 = vst [vmem:[#allocation2 + $0x60] sm:$0xff] %v1252_v14  ;;  %v1355_v23 = vadd.f32 %v3799_v21, %v1252_v14 }
 0x2ec   : > { %v1387_v27 = vmax.f32 %v1355_v23, 0.0 }
 0x2ed   : > { %v1192_v19 = vpop.f32.mrf.mxu2 }
 0x2ee   : > { %v1193_v16 = vadd.f32 %v1192_v19, %v1103_v37  ;;  %v1118_v44 = vpop.f32.mrf.mxu1 }
 0x2f0   : > { %v1253_v22 = vadd.f32 %v1193_v16, %v851_v18  ;;  %v859_v18 = vld [vmem:[#allocation2 + $0x90] sm:$0xff] }
 0x2f2   : > { %1285 = vst [vmem:[#allocation2 + $0xf0] sm:$0xff] %v1253_v22  ;;  %1234 = vmatmul.bf16.gmra.mxu2 %v2848_v20  ;;  %v1356_v26 = vadd.f32 %v3799_v21, %v1253_v22 }
 0x2f4   : > { %v1388_v28 = vmax.f32 %v1356_v26, 0.0 }
 0x2f5   : > { %v1195_v30 = vpop.f32.mrf.mxu2 }
 0x2f6   : > { %v1196_v31 = vadd.f32 %v1195_v30, %v1106_v53  ;;  %v1413_v32 = vpack.c.bf16 %v1388_v28, %v1387_v27  ;;  %v1121_v52 = vpop.f32.mrf.mxu1  ;;  %v860_v30 = vld [vmem:[#allocation2 + $0x70] sm:$0xff] }
 0x2f8   : > { %v1254_v24 = vadd.f32 %v1196_v31, %v852_v29  ;;  %1526 = vmatmul.bf16.gmra.mxu3 %v1413_v32 }
 0x2fa   : > { %1286 = vst [vmem:[#allocation2 + $0x8] sm:$0xff] %v1254_v24  ;;  %v1357_v39 = vadd.f32 %v3799_v21, %v1254_v24 }
 0x2fc   : > { %v1389_v37 = vmax.f32 %v1357_v39, 0.0 }
 0x2fd   : > { %v1197_v35 = vpop.f32.mrf.mxu2 }
 0x2fe   : > { %v1198_v36 = vadd.f32 %v1197_v35, %v1108_v1  ;;  %v1123_v62 = vpop.f32.mrf.mxu1 }
 0x300   : > { %v1255_v38 = vadd.f32 %v1198_v36, %v853_v34  ;;  %v861_v36 = vld [vmem:[#allocation2 + $0xc0] sm:$0xff] }
 0x302   : > { %1287 = vst [vmem:[#allocation2 + $0x78] sm:$0xff] %v1255_v38  ;;  %v1358_v40 = vadd.f32 %v3799_v21, %v1255_v38 }
 0x304   : > { %v1390_v41 = vmax.f32 %v1358_v40, 0.0 }
 0x305   : > { %v1200_v43 = vpop.f32.mrf.mxu2 }
 0x306   : > { %v1201_v46 = vadd.f32 %v1200_v43, %v1111_v13  ;;  %v1414_v47 = vpack.c.bf16 %v1390_v41, %v1389_v37  ;;  %v1126_v8 = vpop.f32.mrf.mxu1 }
 0x308   : > { %v1256_v48 = vadd.f32 %v1201_v46, %v854_v42  ;;  %1531 = vmatmul.bf16.gmra.mxu3 %v1414_v47 }
 0x30a   : > { %1288 = vst [vmem:[#allocation2 + $0x38] sm:$0xff] %v1256_v48  ;;  %v1359_v53 = vadd.f32 %v3799_v21, %v1256_v48  ;;  %v862_v48 = vld [vmem:[#allocation2 + $0xa8] sm:$0xff] }
 0x30c   : > { %v1391_v55 = vmax.f32 %v1359_v53, 0.0 }
 0x30d   : > { %v1202_v50 = vpop.f32.mrf.mxu2 }
 0x30e   : > { %v1203_v51 = vadd.f32 %v1202_v50, %v1113_v25  ;;  %v1128_v16 = vpop.f32.mrf.mxu1 }
 0x310   : > { %v1257_v45 = vadd.f32 %v1203_v51, %v855_v49 }
 0x312   : > { %1289 = vst [vmem:[#allocation2 + $0x58] sm:$0xff] %v1257_v45  ;;  %v1360_v54 = vadd.f32 %v3799_v21, %v1257_v45 }
 0x314   : > { %v1392_v56 = vmax.f32 %v1360_v54, 0.0  ;;  %v863_v54 = vld [vmem:[#allocation2 + $0xd0] sm:$0xff] }
 0x315   : > { %v1205_v59 = vpop.f32.mrf.mxu2 }
 0x316   : > { %v1206_v60 = vadd.f32 %v1205_v59, %v1116_v33  ;;  %v1415_v61 = vpack.c.bf16 %v1392_v56, %v1391_v55  ;;  %v1131_v33 = vpop.f32.mrf.mxu1 }
 0x318   : > { %v1258_v58 = vadd.f32 %v1206_v60, %v856_v57  ;;  %1536 = vmatmul.bf16.gmra.mxu3 %v1415_v61 }
 0x31a   : > { %1290 = vst [vmem:[#allocation2 + $0x40] sm:$0xff] %v1258_v58  ;;  %v1361_v5 = vadd.f32 %v3799_v21, %v1258_v58 }
 0x31b   : > { %v1497_v63 = vpop.f32.mrf.mxu3 }
 0x31c   : > { %v1393_v10 = vmax.f32 %v1361_v5, 0.0 }
 0x31d   : > { %v1207_v1 = vpop.f32.mrf.mxu2 }
 0x31e   : > { %v1208_v3 = vadd.f32 %v1207_v1, %v1118_v44  ;;  %v1133_v41 = vpop.f32.mrf.mxu1  ;;  %v864_v1 = vld [vmem:[#allocation2 + $0x10] sm:$0xff] }
 0x320   : > { %v1259_v4 = vadd.f32 %v1208_v3, %v857_v0 }
 0x322   : > { %1291 = vst [vmem:[#allocation2 + $0xc8] sm:$0xff] %v1259_v4  ;;  %v1362_v6 = vadd.f32 %v3799_v21, %v1259_v4 }
 0x323   : > { %v1499_v7 = vpop.f32.mrf.mxu3 }
 0x324   : > { %v3197_v2 = vpack.c.bf16 %v1499_v7, %v1497_v63  ;;  %v1394_v9 = vmax.f32 %v1362_v6, 0.0 }
 0x325   : > { %v1210_v12 = vpop.f32.mrf.mxu2 }
 0x326   : > { %v1211_v13 = vadd.f32 %v1210_v12, %v1121_v52  ;;  %3198 = vst [vmem:[#allocation4] sm:$0xff] %v3197_v2   ;;  %v1416_v14 = vpack.c.bf16 %v1394_v9, %v1393_v10  ;;  %v1136_v45 = vpop.f32.mrf.mxu1 }
 0x328   : > { %v1260_v17 = vadd.f32 %v1211_v13, %v858_v11  ;;  %1541 = vmatmul.bf16.gmra.mxu3 %v1416_v14 }
 0x32a   : > { %1292 = vst [vmem:[#allocation2 + $0xe0] sm:$0xff] %v1260_v17  ;;  %v1363_v23 = vadd.f32 %v3799_v21, %v1260_v17 }
 0x32b   : > { %v1502_v15 = vpop.f32.mrf.mxu3 }
 0x32c   : > { %v1395_v28 = vmax.f32 %v1363_v23, 0.0 }
 0x32d   : > { %v1212_v19 = vpop.f32.mrf.mxu2 }
 0x32e   : > { %v1213_v20 = vadd.f32 %v1212_v19, %v1123_v62  ;;  %v1138_v0 = vpop.f32.mrf.mxu1  ;;  %v866_v19 = vld [vmem:[#allocation2 + $0xa0] sm:$0xff] }
 0x330   : > { %v1261_v22 = vadd.f32 %v1213_v20, %v859_v18 }
 0x332   : > { %1293 = vst [vmem:[#allocation2 + $0x90] sm:$0xff] %v1261_v22  ;;  %v1364_v25 = vadd.f32 %v3799_v21, %v1261_v22 }
 0x333   : > { %v1504_v26 = vpop.f32.mrf.mxu3 }
 0x334   : > { %v3202_v27 = vpack.c.bf16 %v1504_v26, %v1502_v15  ;;  %v1396_v29 = vmax.f32 %v1364_v25, 0.0 }
 0x335   : > { %v1215_v31 = vpop.f32.mrf.mxu2 }
 0x336   : > { %v1216_v32 = vadd.f32 %v1215_v31, %v1126_v8  ;;  %3274 = vst [vmem:[#allocation4 + $0x8] sm:$0xff] %v3202_v27   ;;  %v1417_v24 = vpack.c.bf16 %v1396_v29, %v1395_v28  ;;  %v865_v8 = vld [vmem:[#allocation2 + $0x28] sm:$0xff]  ;;  %v1141_v9 = vpop.f32.mrf.mxu1  ;;  %v867_v27 = vld [vmem:[#allocation2 + $0xf8] sm:$0xff] }
 0x338   : > { %v1262_v34 = vadd.f32 %v1216_v32, %v860_v30  ;;  %1546 = vmatmul.bf16.gmra.mxu3 %v1417_v24 }
 0x33a   : > { %1294 = vst [vmem:[#allocation2 + $0x70] sm:$0xff] %v1262_v34  ;;  %v1365_v37 = vadd.f32 %v3799_v21, %v1262_v34 }
 0x33b   : > { %v1507_v35 = vpop.f32.mrf.mxu3 }
 0x33c   : > { %v1397_v46 = vmax.f32 %v1365_v37, 0.0 }
 0x33d   : > { %v1217_v38 = vpop.f32.mrf.mxu2 }
 0x33e   : > { %v1218_v39 = vadd.f32 %v1217_v38, %v1128_v16  ;;  %v1143_v25 = vpop.f32.mrf.mxu1  ;;  %v868_v38 = vld [vmem:[#allocation2 + $0x20] sm:$0xff] }
 0x340   : > { %v1263_v40 = vadd.f32 %v1218_v39, %v861_v36 }
 0x342   : > { %1295 = vst [vmem:[#allocation2 + $0xc0] sm:$0xff] %v1263_v40  ;;  %v1366_v42 = vadd.f32 %v3799_v21, %v1263_v40 }
 0x343   : > { %v1509_v43 = vpop.f32.mrf.mxu3 }
 0x344   : > { %v3207_v44 = vpack.c.bf16 %v1509_v43, %v1507_v35  ;;  %v1398_v47 = vmax.f32 %v1366_v42, 0.0 }
 0x345   : > { %v1220_v49 = vpop.f32.mrf.mxu2 }
 0x346   : > { %v1221_v50 = vadd.f32 %v1220_v49, %v1131_v33  ;;  %3275 = vst [vmem:[#allocation4 + $0x10] sm:$0xff] %v3207_v44   ;;  %v1418_v51 = vpack.c.bf16 %v1398_v47, %v1397_v46  ;;  %v1146_v24 = vpop.f32.mrf.mxu1  ;;  %v869_v44 = vld [vmem:[#allocation2 + $0x98] sm:$0xff] }
 0x348   : > { %v1264_v52 = vadd.f32 %v1221_v50, %v862_v48  ;;  %1551 = vmatmul.bf16.gmra.mxu3 %v1418_v51 }
 0x34a   : > { %1296 = vst [vmem:[#allocation2 + $0xa8] sm:$0xff] %v1264_v52  ;;  %v1367_v59 = vadd.f32 %v3799_v21, %v1264_v52 }
 0x34b   : > { %v1512_v53 = vpop.f32.mrf.mxu3 }
 0x34c   : > { %v1399_v62 = vmax.f32 %v1367_v59, 0.0 }
 0x34d   : > { %v1222_v55 = vpop.f32.mrf.mxu2 }
 0x34e   : > { %v1223_v56 = vadd.f32 %v1222_v55, %v1133_v41  ;;  %v1148_v43 = vpop.f32.mrf.mxu1 }
 0x350   : > { %v1265_v57 = vadd.f32 %v1223_v56, %v863_v54 }
 0x352   : > { %1297 = vst [vmem:[#allocation2 + $0xd0] sm:$0xff] %v1265_v57  ;;  %v1368_v60 = vadd.f32 %v3799_v21, %v1265_v57 }
 0x353   : > { %v1514_v61 = vpop.f32.mrf.mxu3 }
 0x354   : > { %v3212_v58 = vpack.c.bf16 %v1514_v61, %v1512_v53  ;;  %v1400_v63 = vmax.f32 %v1368_v60, 0.0 }
 0x355   : > { %v1225_v3 = vpop.f32.mrf.mxu2 }
 0x356   : > { %v1226_v4 = vadd.f32 %v1225_v3, %v1136_v45  ;;  %3276 = vst [vmem:[#allocation4 + $0x18] sm:$0xff] %v3212_v58   ;;  %v1419_v5 = vpack.c.bf16 %v1400_v63, %v1399_v62 }
 0x358   : > { %v1266_v6 = vadd.f32 %v1226_v4, %v864_v1  ;;  %1556 = vmatmul.bf16.gmra.mxu3 %v1419_v5 }
 0x35a   : > { %1298 = vst [vmem:[#allocation2 + $0x10] sm:$0xff] %v1266_v6  ;;  %v1369_v12 = vadd.f32 %v3799_v21, %v1266_v6 }
 0x35b   : > { %v1517_v7 = vpop.f32.mrf.mxu3 }
 0x35c   : > { %v1401_v15 = vmax.f32 %v1369_v12, 0.0 }
 0x35d   : > { %v1227_v2 = vpop.f32.mrf.mxu2 }
 0x35e   : > { %v1228_v10 = vadd.f32 %v1227_v2, %v1138_v0 }
 0x360   : > { %v1267_v11 = vadd.f32 %v1228_v10, %v865_v8 }
 0x362   : > { %1299 = vst [vmem:[#allocation2 + $0x28] sm:$0xff] %v1267_v11  ;;  %v1370_v13 = vadd.f32 %v3799_v21, %v1267_v11 }
 0x363   : > { %v1519_v14 = vpop.f32.mrf.mxu3 }
 0x364   : > { %v3217_v17 = vpack.c.bf16 %v1519_v14, %v1517_v7  ;;  %v1402_v18 = vmax.f32 %v1370_v13, 0.0 }
 0x365   : > { %v1230_v16 = vpop.f32.mrf.mxu2 }
 0x366   : > { %v1231_v20 = vadd.f32 %v1230_v16, %v1141_v9  ;;  %3277 = vst [vmem:[#allocation4 + $0x20] sm:$0xff] %v3217_v17   ;;  %v1420_v22 = vpack.c.bf16 %v1402_v18, %v1401_v15 }
 0x368   : > { %v1268_v23 = vadd.f32 %v1231_v20, %v866_v19  ;;  %1561 = vmatmul.bf16.gmra.mxu3 %v1420_v22 }
 0x36a   : > { %1300 = vst [vmem:[#allocation2 + $0xa0] sm:$0xff] %v1268_v23  ;;  %v1371_v31 = vadd.f32 %v3799_v21, %v1268_v23 }
 0x36b   : > { %v1522_v26 = vpop.f32.mrf.mxu3 }
 0x36c   : > { %v1403_v35 = vmax.f32 %v1371_v31, 0.0 }
 0x36d   : > { %v1232_v28 = vpop.f32.mrf.mxu2 }
 0x36e   : > { %v1233_v29 = vadd.f32 %v1232_v28, %v1143_v25 }
 0x370   : > { %v1269_v30 = vadd.f32 %v1233_v29, %v867_v27 }
 0x372   : > { %1301 = vst [vmem:[#allocation2 + $0xf8] sm:$0xff] %v1269_v30  ;;  %v1372_v32 = vadd.f32 %v3799_v21, %v1269_v30 }
 0x373   : > { %v1524_v33 = vpop.f32.mrf.mxu3 }
 0x374   : > { %v3222_v34 = vpack.c.bf16 %v1524_v33, %v1522_v26  ;;  %v1404_v36 = vmax.f32 %v1372_v32, 0.0 }
 0x375   : > { %v1235_v39 = vpop.f32.mrf.mxu2 }
 0x376   : > { %v1236_v40 = vadd.f32 %v1235_v39, %v1146_v24  ;;  %3278 = vst [vmem:[#allocation4 + $0x28] sm:$0xff] %v3222_v34   ;;  %v1421_v37 = vpack.c.bf16 %v1404_v36, %v1403_v35 }
 0x378   : > { %v1270_v41 = vadd.f32 %v1236_v40, %v868_v38  ;;  %1566 = vmatmul.bf16.gmra.mxu3 %v1421_v37 }
 0x37a   : > { %1302 = vst [vmem:[#allocation2 + $0x20] sm:$0xff] %v1270_v41  ;;  %v1373_v49 = vadd.f32 %v3799_v21, %v1270_v41 }
 0x37b   : > { %v1527_v42 = vpop.f32.mrf.mxu3 }
 0x37c   : > { %v1405_v45 = vmax.f32 %v1373_v49, 0.0 }
 0x37d   : > { %v1237_v46 = vpop.f32.mrf.mxu2 }
 0x37e   : > { %v1238_v47 = vadd.f32 %v1237_v46, %v1148_v43 }
 0x380   : > { %v1271_v48 = vadd.f32 %v1238_v47, %v869_v44 }
 0x382   : > { %1303 = vst [vmem:[#allocation2 + $0x98] sm:$0xff] %v1271_v48  ;;  %v1374_v50 = vadd.f32 %v3799_v21, %v1271_v48 }
 0x383   : > { %v1529_v51 = vpop.f32.mrf.mxu3 }
 0x384   : > { %v3227_v52 = vpack.c.bf16 %v1529_v51, %v1527_v42  ;;  %v1406_v53 = vmax.f32 %v1374_v50, 0.0 }
 0x386   : > { %3279 = vst [vmem:[#allocation4 + $0x30] sm:$0xff] %v3227_v52   ;;  %v1422_v54 = vpack.c.bf16 %v1406_v53, %v1405_v45 }
 0x388   : > { %1571 = vmatmul.bf16.gmra.mxu3 %v1422_v54 }
 0x38b   : > { %v1532_v55 = vpop.f32.mrf.mxu3 }
 0x393   : > { %v1534_v56 = vpop.f32.mrf.mxu3 }
 0x394   : > { %v3232_v57 = vpack.c.bf16 %v1534_v56, %v1532_v55 }
 0x396   : > { %3280 = vst [vmem:[#allocation4 + $0x38] sm:$0xff] %v3232_v57  }
 0x39b   : > { %v1537_v59 = vpop.f32.mrf.mxu3 }
 0x3a3   : > { %v1539_v60 = vpop.f32.mrf.mxu3 }
 0x3a4   : > { %v3237_v61 = vpack.c.bf16 %v1539_v60, %v1537_v59 }
 0x3a6   : > { %3281 = vst [vmem:[#allocation4 + $0x40] sm:$0xff] %v3237_v61  }
 0x3ab   : > { %v1542_v58 = vpop.f32.mrf.mxu3 }
 0x3b3   : > { %v1544_v62 = vpop.f32.mrf.mxu3 }
 0x3b4   : > { %v3242_v63 = vpack.c.bf16 %v1544_v62, %v1542_v58 }
 0x3b6   : > { %3282 = vst [vmem:[#allocation4 + $0x48] sm:$0xff] %v3242_v63  }
 0x3bb   : > { %v1547_v21 = vpop.f32.mrf.mxu3 }
 0x3c3   : > { %v1549_v0 = vpop.f32.mrf.mxu3 }
 0x3c4   : > { %v3247_v1 = vpack.c.bf16 %v1549_v0, %v1547_v21 }
 0x3c6   : > { %3283 = vst [vmem:[#allocation4 + $0x50] sm:$0xff] %v3247_v1  }
 0x3cb   : > { %v1552_v3 = vpop.f32.mrf.mxu3 }
 0x3d3   : > { %v1554_v4 = vpop.f32.mrf.mxu3 }
 0x3d4   : > { %v3252_v5 = vpack.c.bf16 %v1554_v4, %v1552_v3 }
 0x3d6   : > { %3284 = vst [vmem:[#allocation4 + $0x58] sm:$0xff] %v3252_v5  }
 0x3db   : > { %v1557_v6 = vpop.f32.mrf.mxu3 }
 0x3e3   : > { %v1559_v7 = vpop.f32.mrf.mxu3 }
 0x3e4   : > { %v3257_v8 = vpack.c.bf16 %v1559_v7, %v1557_v6 }
 0x3e6   : > { %3285 = vst [vmem:[#allocation4 + $0x60] sm:$0xff] %v3257_v8  }
 0x3eb   : > { %v1562_v2 = vpop.f32.mrf.mxu3 }
 0x3f3   : > { %v1564_v10 = vpop.f32.mrf.mxu3 }
 0x3f4   : > { %v3262_v9 = vpack.c.bf16 %v1564_v10, %v1562_v2 }
 0x3f6   : > { %3286 = vst [vmem:[#allocation4 + $0x68] sm:$0xff] %v3262_v9  }
 0x3fb   : > { %v1567_v11 = vpop.f32.mrf.mxu3 }
 0x403   : > { %v1569_v12 = vpop.f32.mrf.mxu3 }
 0x404   : > { %v3267_v13 = vpack.c.bf16 %v1569_v12, %v1567_v11 }
 0x406   : > { %3287 = vst [vmem:[#allocation4 + $0x70] sm:$0xff] %v3267_v13  }
 0x40b   : > { %v1572_v14 = vpop.f32.mrf.mxu3 }
 0x413   : > { %v1574_v17 = vpop.f32.mrf.mxu3 }
 0x414   : > { %v3272_v15 = vpack.c.bf16 %v1574_v17, %v1572_v14 }
 0x416   : > { %3288 = vst [vmem:[#allocation4 + $0x78] sm:$0xff] %v3272_v15  }
 0x417 PF: > { %p2881_p9 = scmp.ne.s32.totalorder %s3568_s17, 1 }
 0x419   : > { %1648 = sbr.rel (%p2881_p9) target bundleno = 1797 (0x705), region = 100 }
 0x41e   : > { %v3183_v18 = vld [vmem:[#allocation4 + $0x38] sm:$0xff]  ;;  %v3182_v16 = vld [vmem:[#allocation4 + $0x30] sm:$0xff]  ;;  %v3181_v22 = vld [vmem:[#allocation4 + $0x28] sm:$0xff] }
 0x41f   : > { %v3191_v19 = vld [vmem:[#allocation4 + $0x78] sm:$0xff]  ;;  %2006 = vmatpush.bf16.msra.mxu0 %v3183_v18  ;;  %3289 = vmatpush.bf16.msra.mxu2 %v3183_v18  ;;  %v3190_v20 = vld [vmem:[#allocation4 + $0x70] sm:$0xff]  ;;  %v3189_v23 = vld [vmem:[#allocation4 + $0x68] sm:$0xff] }
 0x420   : > { %2095 = vmatpush.bf16.msra.mxu1 %v3191_v19  ;;  %3297 = vmatpush.bf16.msra.mxu3 %v3191_v19  ;;  %v3180_v25 = vld [vmem:[#allocation4 + $0x20] sm:$0xff]  ;;  %v3179_v27 = vld [vmem:[#allocation4 + $0x18] sm:$0xff]  ;;  %v3178_v29 = vld [vmem:[#allocation4 + $0x10] sm:$0xff] }
 0x421   : > { %v3188_v26 = vld [vmem:[#allocation4 + $0x60] sm:$0xff]  ;;  %v3187_v28 = vld [vmem:[#allocation4 + $0x58] sm:$0xff]  ;;  %v3186_v30 = vld [vmem:[#allocation4 + $0x50] sm:$0xff] }
 0x422   : > { %v3177_v31 = vld [vmem:[#allocation4 + $0x8] sm:$0xff]  ;;  %v3176_v24 = vld [vmem:[#allocation4] sm:$0xff]  ;;  %v2892_v47 = vld [vmem:[#allocation5 + $0x10] sm:$0xf] }
 0x423   : > { %2007 = vmatpush.bf16.msra.mxu0 %v3182_v16  ;;  %3290 = vmatpush.bf16.msra.mxu2 %v3182_v16  ;;  %v3185_v32 = vld [vmem:[#allocation4 + $0x48] sm:$0xff]  ;;  %v3184_v33 = vld [vmem:[#allocation4 + $0x40] sm:$0xff]  ;;  %v3147_v48 = vld [vmem:[#allocation5 + $0x14] sm:$0xf0] }
 0x424   : > { %2096 = vmatpush.bf16.msra.mxu1 %v3190_v20  ;;  %3298 = vmatpush.bf16.msra.mxu3 %v3190_v20  ;;  %v2884_v34 = vld [vmem:[#allocation5] sm:$0xf]  ;;  %v3145_v35 = vld [vmem:[#allocation5 + $0x4] sm:$0xf0]  ;;  %v3144_v39 = vld [vmem:[#allocation5 + $0x4] sm:$0xf]  ;;  %v2893_v54 = vor.u32 %v3147_v48, %v2892_v47 }
 0x425   : > { %v2964_v36 = vld [vmem:[#allocation5 + $0xa0] sm:$0xf]  ;;  %v3165_v38 = vld [vmem:[#allocation5 + $0xa4] sm:$0xf0]  ;;  %v2886_v40 = vld [vmem:[#allocation5 + $0x8] sm:$0xf0]  ;;  %v2885_v42 = vor.u32 %v3145_v35, %v2884_v34 }
 0x426   : > { %v3164_v37 = vld [vmem:[#allocation5 + $0xa4] sm:$0xf]  ;;  %v2966_v41 = vld [vmem:[#allocation5 + $0xa8] sm:$0xf0]  ;;  %v2965_v43 = vor.u32 %v3165_v38, %v2964_v36  ;;  %v2889_v44 = vor.u32 %v3144_v39, %v2886_v40  ;;  %v2972_v49 = vld [vmem:[#allocation5 + $0xb0] sm:$0xf] }
 0x427   : > { %2008 = vmatpush.bf16.msra.mxu0 %v3181_v22  ;;  %3291 = vmatpush.bf16.msra.mxu2 %v3181_v22  ;;  %v2969_v46 = vor.u32 %v3164_v37, %v2966_v41  ;;  %v3167_v50 = vld [vmem:[#allocation5 + $0xb4] sm:$0xf0]  ;;  %v3146_v51 = vld [vmem:[#allocation5 + $0x14] sm:$0xf]  ;;  %v2894_v52 = vld [vmem:[#allocation5 + $0x18] sm:$0xf0] }
 0x428   : > { %2097 = vmatpush.bf16.msra.mxu1 %v3189_v23  ;;  %3299 = vmatpush.bf16.msra.mxu3 %v3189_v23  ;;  %v3166_v45 = vld [vmem:[#allocation5 + $0xb4] sm:$0xf]  ;;  %v2974_v53 = vld [vmem:[#allocation5 + $0xb8] sm:$0xf0]  ;;  %v2973_v55 = vor.u32 %v3167_v50, %v2972_v49  ;;  %v2897_v56 = vor.u32 %v3146_v51, %v2894_v52  ;;  %v2900_v59 = vld [vmem:[#allocation5 + $0x20] sm:$0xf] }
 0x429   : > { %v2977_v57 = vor.u32 %v3166_v45, %v2974_v53  ;;  %v3149_v60 = vld [vmem:[#allocation5 + $0x24] sm:$0xf0]  ;;  %v2980_v61 = vld [vmem:[#allocation5 + $0xc0] sm:$0xf]  ;;  %v3148_v62 = vld [vmem:[#allocation5 + $0x24] sm:$0xf] }
 0x42a   : > { %v3169_v58 = vld [vmem:[#allocation5 + $0xc4] sm:$0xf0]  ;;  %v2902_v63 = vld [vmem:[#allocation5 + $0x28] sm:$0xf0]  ;;  %v3168_v21 = vld [vmem:[#allocation5 + $0xc4] sm:$0xf]  ;;  %v2901_v1 = vor.u32 %v3149_v60, %v2900_v59 }
 0x42b   : > { %2009 = vmatpush.bf16.msra.mxu0 %v3180_v25  ;;  %3292 = vmatpush.bf16.msra.mxu2 %v3180_v25  ;;  %v2982_v0 = vld [vmem:[#allocation5 + $0xc8] sm:$0xf0]  ;;  %v2981_v3 = vor.u32 %v3169_v58, %v2980_v61  ;;  %v2905_v4 = vor.u32 %v3148_v62, %v2902_v63  ;;  %v2908_v6 = vld [vmem:[#allocation5 + $0x30] sm:$0xf]  ;;  %v3151_v7 = vld [vmem:[#allocation5 + $0x34] sm:$0xf0] }
 0x42c   : > { %2098 = vmatpush.bf16.msra.mxu1 %v3188_v26  ;;  %3300 = vmatpush.bf16.msra.mxu3 %v3188_v26  ;;  %v2985_v5 = vor.u32 %v3168_v21, %v2982_v0  ;;  %v2988_v8 = vld [vmem:[#allocation5 + $0xd0] sm:$0xf]  ;;  %v3171_v2 = vld [vmem:[#allocation5 + $0xd4] sm:$0xf0]  ;;  %v3150_v10 = vld [vmem:[#allocation5 + $0x34] sm:$0xf]  ;;  %v2909_v13 = vor.u32 %v3151_v7, %v2908_v6 }
 0x42d   : > { %v2910_v9 = vld [vmem:[#allocation5 + $0x38] sm:$0xf0]  ;;  %v3170_v11 = vld [vmem:[#allocation5 + $0xd4] sm:$0xf]  ;;  %v2989_v14 = vor.u32 %v3171_v2, %v2988_v8  ;;  %v2916_v18 = vld [vmem:[#allocation5 + $0x40] sm:$0xf] }
 0x42e   : > { %v2990_v12 = vld [vmem:[#allocation5 + $0xd8] sm:$0xf0]  ;;  %v2913_v17 = vor.u32 %v3150_v10, %v2910_v9  ;;  %v3153_v19 = vld [vmem:[#allocation5 + $0x44] sm:$0xf0]  ;;  %v2996_v16 = vld [vmem:[#allocation5 + $0xe0] sm:$0xf] }
 0x42f   : > { %2010 = vmatpush.bf16.msra.mxu0 %v3179_v27  ;;  %3293 = vmatpush.bf16.msra.mxu2 %v3179_v27  ;;  %v2993_v15 = vor.u32 %v3170_v11, %v2990_v12  ;;  %v3173_v20 = vld [vmem:[#allocation5 + $0xe4] sm:$0xf0]  ;;  %v3152_v22 = vld [vmem:[#allocation5 + $0x44] sm:$0xf]  ;;  %v2918_v23 = vld [vmem:[#allocation5 + $0x48] sm:$0xf0]  ;;  %v2917_v27 = vor.u32 %v3153_v19, %v2916_v18 }
 0x430   : > { %2099 = vmatpush.bf16.msra.mxu1 %v3187_v28  ;;  %3301 = vmatpush.bf16.msra.mxu3 %v3187_v28  ;;  %v3172_v25 = vld [vmem:[#allocation5 + $0xe4] sm:$0xf]  ;;  %v2998_v26 = vld [vmem:[#allocation5 + $0xe8] sm:$0xf0]  ;;  %v2997_v28 = vor.u32 %v3173_v20, %v2996_v16  ;;  %v3154_v34 = vld [vmem:[#allocation5 + $0x54] sm:$0xf] }
 0x431   : > { %v2926_v35 = vld [vmem:[#allocation5 + $0x58] sm:$0xf0]  ;;  %v3174_v36 = vld [vmem:[#allocation5 + $0xf4] sm:$0xf]  ;;  %v2940_v49 = vld [vmem:[#allocation5 + $0x70] sm:$0xf] }
 0x432   : > { %v3006_v38 = vld [vmem:[#allocation5 + $0xf8] sm:$0xf0]  ;;  %v2929_v37 = vor.u32 %v3154_v34, %v2926_v35  ;;  %v3159_v50 = vld [vmem:[#allocation5 + $0x74] sm:$0xf0]  ;;  %v3158_v51 = vld [vmem:[#allocation5 + $0x74] sm:$0xf] }
 0x433   : > { %2011 = vmatpush.bf16.msra.mxu0 %v3178_v29  ;;  %3294 = vmatpush.bf16.msra.mxu2 %v3178_v29  ;;  %v2921_v29 = vor.u32 %v3152_v22, %v2918_v23  ;;  %v3009_v41 = vor.u32 %v3174_v36, %v3006_v38  ;;  %v2942_v52 = vld [vmem:[#allocation5 + $0x78] sm:$0xf0]  ;;  %v2941_v45 = vor.u32 %v3159_v50, %v2940_v49  ;;  %v1650_v58 = vld [vmem:[#allocation2 + $0xb0] sm:$0xff]  ;;  %v3853_v6 = vld [vmem:[%s4010_s5] ss:$0 sm:$0xff] }
 0x434   : > { %2100 = vmatpush.bf16.msra.mxu1 %v3186_v30  ;;  %3302 = vmatpush.bf16.msra.mxu3 %v3186_v30  ;;  %v3001_v30 = vor.u32 %v3172_v25, %v2998_v26  ;;  %v2945_v53 = vor.u32 %v3158_v51, %v2942_v52  ;;  %v1651_v7 = vld [vmem:[#allocation2] sm:$0xff]  ;;  %v3163_v11 = vld [vmem:[#allocation5 + $0x94] sm:$0xf0]  ;;  %v1671_v19 = vld [vmem:[#allocation2 + $0x90] sm:$0xff] }
 0x435   : > { %v2956_v9 = vld [vmem:[#allocation5 + $0x90] sm:$0xf] }
 0x436   : > { %v2957_v20 = vor.u32 %v3163_v11, %v2956_v9  ;;  %v1673_v52 = vld [vmem:[#allocation2 + $0xc0] sm:$0xff] }
 0x437   : > { %2012 = vmatpush.bf16.msra.mxu0 %v3177_v31  ;;  %3295 = vmatpush.bf16.msra.mxu2 %v3177_v31  ;;  %v2924_v31 = vld [vmem:[#allocation5 + $0x50] sm:$0xf] }
 0x438   : > { %2101 = vmatpush.bf16.msra.mxu1 %v3185_v32  ;;  %3303 = vmatpush.bf16.msra.mxu3 %v3185_v32  ;;  %v3155_v32 = vld [vmem:[#allocation5 + $0x54] sm:$0xf0] }
 0x439   : > { %v2925_v39 = vor.u32 %v3155_v32, %v2924_v31 }
 0x43b   : > { %2013 = vmatpush.bf16.msra.mxu0 %v3176_v24  ;;  %3296 = vmatpush.bf16.msra.mxu2 %v3176_v24  ;;  %v3004_v24 = vld [vmem:[#allocation5 + $0xf0] sm:$0xf] }
 0x43c   : > { %2102 = vmatpush.bf16.msra.mxu1 %v3184_v33  ;;  %3304 = vmatpush.bf16.msra.mxu3 %v3184_v33  ;;  %v3175_v33 = vld [vmem:[#allocation5 + $0xf4] sm:$0xf0] }
 0x43d   : > { %v3005_v40 = vor.u32 %v3175_v33, %v3004_v24 }
 0x43e   : > { %2014 = vmatmul.bf16.vlgmr.msra.gmra.mxu0 %v2885_v42  ;;  %2064 = vmatmul.bf16.vlgmr.msra.gmra.mxu2 %v2965_v43  ;;  %v2932_v42 = vld [vmem:[#allocation5 + $0x60] sm:$0xf]  ;;  %v3157_v43 = vld [vmem:[#allocation5 + $0x64] sm:$0xf0] }
 0x43f   : > { %2103 = vmatmul.bf16.vlgmr.msra.gmra.mxu1 %v2889_v44  ;;  %2153 = vmatmul.bf16.vlgmr.msra.gmra.mxu3 %v2969_v46  ;;  %v3156_v44 = vld [vmem:[#allocation5 + $0x64] sm:$0xf]  ;;  %v2934_v46 = vld [vmem:[#allocation5 + $0x68] sm:$0xf0]  ;;  %v2933_v47 = vor.u32 %v3157_v43, %v2932_v42 }
 0x440   : > { %v2937_v48 = vor.u32 %v3156_v44, %v2934_v46  ;;  %v1653_v43 = vld [vmem:[#allocation2 + $0x18] sm:$0xff] }
 0x44e   : > { %2019 = vmatmul.bf16.gmra.mxu0 %v2893_v54  ;;  %2069 = vmatmul.bf16.gmra.mxu2 %v2973_v55  ;;  %v2948_v54 = vld [vmem:[#allocation5 + $0x80] sm:$0xf]  ;;  %v3161_v55 = vld [vmem:[#allocation5 + $0x84] sm:$0xf0] }
 0x44f   : > { %2108 = vmatmul.bf16.gmra.mxu1 %v2897_v56  ;;  %2158 = vmatmul.bf16.gmra.mxu3 %v2977_v57  ;;  %v3160_v56 = vld [vmem:[#allocation5 + $0x84] sm:$0xf]  ;;  %v2950_v57 = vld [vmem:[#allocation5 + $0x88] sm:$0xf0]  ;;  %v2949_v59 = vor.u32 %v3161_v55, %v2948_v54 }
 0x450   : > { %v2953_v61 = vor.u32 %v3160_v56, %v2950_v57 }
 0x45e   : > { %2024 = vmatmul.bf16.gmra.mxu0 %v2901_v1  ;;  %2074 = vmatmul.bf16.gmra.mxu2 %v2981_v3  ;;  %v1670_v1 = vld [vmem:[#allocation2 + $0xe0] sm:$0xff] }
 0x45f   : > { %2113 = vmatmul.bf16.gmra.mxu1 %v2905_v4  ;;  %2163 = vmatmul.bf16.gmra.mxu3 %v2985_v5 }
 0x46e   : > { %2029 = vmatmul.bf16.gmra.mxu0 %v2909_v13  ;;  %2079 = vmatmul.bf16.gmra.mxu2 %v2989_v14  ;;  %v3162_v13 = vld [vmem:[#allocation5 + $0x94] sm:$0xf]  ;;  %v2958_v14 = vld [vmem:[#allocation5 + $0x98] sm:$0xf0] }
 0x46f   : > { %2118 = vmatmul.bf16.gmra.mxu1 %v2913_v17  ;;  %2168 = vmatmul.bf16.gmra.mxu3 %v2993_v15  ;;  %v2961_v22 = vor.u32 %v3162_v13, %v2958_v14 }
 0x47e   : > { %2034 = vmatmul.bf16.gmra.mxu0 %v2917_v27  ;;  %2084 = vmatmul.bf16.gmra.mxu2 %v2997_v28 }
 0x47f   : > { %2123 = vmatmul.bf16.gmra.mxu1 %v2921_v29  ;;  %2173 = vmatmul.bf16.gmra.mxu3 %v3001_v30  ;;  %v1652_v29 = vld [vmem:[#allocation2 + $0xd8] sm:$0xff] }
 0x48e   : > { %2039 = vmatmul.bf16.gmra.mxu0 %v2925_v39  ;;  %2089 = vmatmul.bf16.gmra.mxu2 %v3005_v40  ;;  %v1672_v39 = vld [vmem:[#allocation2 + $0x70] sm:$0xff] }
 0x48f   : > { %2128 = vmatmul.bf16.gmra.mxu1 %v2929_v37  ;;  %2178 = vmatmul.bf16.gmra.mxu3 %v3009_v41 }
 0x49e   : > { %2044 = vmatmul.bf16.gmra.mxu0 %v2933_v47 }
 0x49f   : > { %2133 = vmatmul.bf16.gmra.mxu1 %v2937_v48 }
 0x4ae   : > { %2049 = vmatmul.bf16.gmra.mxu0 %v2941_v45 }
 0x4af   : > { %2138 = vmatmul.bf16.gmra.mxu1 %v2945_v53 }
 0x4bb   : > { %v2015_v60 = vpop.f32.mrf.mxu0 }
 0x4bc   : > { %v2104_v62 = vpop.f32.mrf.mxu1 }
 0x4bd   : > { %v2105_v63 = vadd.f32 %v2104_v62, %v2015_v60 }
 0x4be   : > { %2054 = vmatmul.bf16.gmra.mxu0 %v2949_v59  ;;  %v1654_v59 = vld [vmem:[#allocation2 + $0x50] sm:$0xff] }
 0x4bf   : > { %v2184_v21 = vadd.f32 %v2105_v63, %v1650_v58  ;;  %2143 = vmatmul.bf16.gmra.mxu1 %v2953_v61 }
 0x4c1   : > { %2216 = vst [vmem:[#allocation2 + $0xb0] sm:$0xff] %v2184_v21  ;;  %v2065_v0 = vpop.f32.mrf.mxu2  ;;  %v2287_v17 = vadd.f32 %v3853_v6, %v2184_v21 }
 0x4c2   : > { %v2154_v3 = vpop.f32.mrf.mxu3 }
 0x4c3   : > { %v2155_v4 = vadd.f32 %v2154_v3, %v2065_v0  ;;  %v2017_v5 = vpop.f32.mrf.mxu0  ;;  %v2319_v27 = vmax.f32 %v2287_v17, 0.0 }
 0x4c4   : > { %v2106_v8 = vpop.f32.mrf.mxu1 }
 0x4c5   : > { %v2204_v2 = vadd.f32 %v2155_v4, %v1670_v1  ;;  %v2107_v10 = vadd.f32 %v2106_v8, %v2017_v5  ;;  %v1674_v4 = vld [vmem:[#allocation2 + $0xa8] sm:$0xff] }
 0x4c7   : > { %2236 = vst [vmem:[#allocation2 + $0xe0] sm:$0xff] %v2204_v2  ;;  %v2185_v12 = vadd.f32 %v2107_v10, %v1651_v7  ;;  %v2307_v26 = vadd.f32 %v3853_v6, %v2204_v2  ;;  %v1655_v10 = vld [vmem:[#allocation2 + $0x68] sm:$0xff] }
 0x4c9   : > { %2217 = vst [vmem:[#allocation2] sm:$0xff] %v2185_v12  ;;  %v2067_v15 = vpop.f32.mrf.mxu2  ;;  %v2288_v18 = vadd.f32 %v3853_v6, %v2185_v12  ;;  %v2339_v35 = vmax.f32 %v2307_v26, 0.0 }
 0x4ca   : > { %v2156_v16 = vpop.f32.mrf.mxu3 }
 0x4cb   : > { %v2157_v23 = vadd.f32 %v2156_v16, %v2067_v15  ;;  %v2020_v25 = vpop.f32.mrf.mxu0  ;;  %v2320_v28 = vmax.f32 %v2288_v18, 0.0  ;;  %v1675_v18 = vld [vmem:[#allocation2 + $0xd0] sm:$0xff] }
 0x4cc   : > { %v2109_v30 = vpop.f32.mrf.mxu1 }
 0x4cd   : > { %v2205_v31 = vadd.f32 %v2157_v23, %v1671_v19  ;;  %v2110_v32 = vadd.f32 %v2109_v30, %v2020_v25  ;;  %v3858_v24 = vpack.c.bf16 %v2320_v28, %v2319_v27  ;;  %v1656_v25 = vld [vmem:[#allocation2 + $0x30] sm:$0xff] }
 0x4ce   : > { %2059 = vmatmul.bf16.gmra.mxu0 %v2957_v20 }
 0x4cf   : > { %2237 = vst [vmem:[#allocation2 + $0x90] sm:$0xff] %v2205_v31  ;;  %v2186_v33 = vadd.f32 %v2110_v32, %v1652_v29  ;;  %2148 = vmatmul.bf16.gmra.mxu1 %v2961_v22  ;;  %v2308_v34 = vadd.f32 %v3853_v6, %v2205_v31  ;;  %v1676_v32 = vld [vmem:[#allocation2 + $0x10] sm:$0xff] }
 0x4d1   : > { %2218 = vst [vmem:[#allocation2 + $0xd8] sm:$0xff] %v2186_v33  ;;  %v2070_v36 = vpop.f32.mrf.mxu2  ;;  %v2340_v38 = vmax.f32 %v2308_v34, 0.0  ;;  %v2289_v49 = vadd.f32 %v3853_v6, %v2186_v33 }
 0x4d2   : > { %v2159_v40 = vpop.f32.mrf.mxu3 }
 0x4d3   : > { %v2160_v37 = vadd.f32 %v2159_v40, %v2070_v36  ;;  %v2022_v41 = vpop.f32.mrf.mxu0  ;;  %v3861_v42 = vpack.c.bf16 %v2340_v38, %v2339_v35  ;;  %v2321_v56 = vmax.f32 %v2289_v49, 0.0  ;;  %v1657_v36 = vld [vmem:[#allocation2 + $0x48] sm:$0xff] }
 0x4d4   : > { %v2111_v44 = vpop.f32.mrf.mxu1 }
 0x4d5   : > { %v2206_v46 = vadd.f32 %v2160_v37, %v1672_v39  ;;  %v2112_v47 = vadd.f32 %v2111_v44, %v2022_v41 }
 0x4d7   : > { %2238 = vst [vmem:[#allocation2 + $0x70] sm:$0xff] %v2206_v46  ;;  %v2187_v48 = vadd.f32 %v2112_v47, %v1653_v43  ;;  %v2309_v55 = vadd.f32 %v3853_v6, %v2206_v46  ;;  %v1677_v46 = vld [vmem:[#allocation2 + $0x28] sm:$0xff] }
 0x4d9   : > { %2219 = vst [vmem:[#allocation2 + $0x18] sm:$0xff] %v2187_v48  ;;  %v2072_v50 = vpop.f32.mrf.mxu2  ;;  %v2290_v51 = vadd.f32 %v3853_v6, %v2187_v48  ;;  %v2341_v0 = vmax.f32 %v2309_v55, 0.0 }
 0x4da   : > { %v2161_v45 = vpop.f32.mrf.mxu3 }
 0x4db   : > { %v2162_v53 = vadd.f32 %v2161_v45, %v2072_v50  ;;  %v2025_v54 = vpop.f32.mrf.mxu0  ;;  %v2322_v57 = vmax.f32 %v2290_v51, 0.0 }
 0x4dc   : > { %v2114_v60 = vpop.f32.mrf.mxu1 }
 0x4dd   : > { %v2207_v61 = vadd.f32 %v2162_v53, %v1673_v52  ;;  %v2115_v58 = vadd.f32 %v2114_v60, %v2025_v54  ;;  %v3866_v62 = vpack.c.bf16 %v2322_v57, %v2321_v56  ;;  %v1658_v52 = vld [vmem:[#allocation2 + $0x80] sm:$0xff] }
 0x4df   : > { %2239 = vst [vmem:[#allocation2 + $0xc0] sm:$0xff] %v2207_v61  ;;  %v2188_v63 = vadd.f32 %v2115_v58, %v1654_v59  ;;  %v2310_v21 = vadd.f32 %v3853_v6, %v2207_v61  ;;  %v1678_v59 = vld [vmem:[#allocation2 + $0xa0] sm:$0xff] }
 0x4e1   : > { %2220 = vst [vmem:[#allocation2 + $0x50] sm:$0xff] %v2188_v63  ;;  %v2075_v1 = vpop.f32.mrf.mxu2  ;;  %v2342_v3 = vmax.f32 %v2310_v21, 0.0  ;;  %v2291_v14 = vadd.f32 %v3853_v6, %v2188_v63  ;;  %v1659_v63 = vld [vmem:[#allocation2 + $0x88] sm:$0xff] }
 0x4e2   : > { %v2164_v5 = vpop.f32.mrf.mxu3 }
 0x4e3   : > { %v2165_v7 = vadd.f32 %v2164_v5, %v2075_v1  ;;  %v2027_v8 = vpop.f32.mrf.mxu0  ;;  %v3869_v2 = vpack.c.bf16 %v2342_v3, %v2341_v0  ;;  %v2323_v22 = vmax.f32 %v2291_v14, 0.0  ;;  %v1679_v5 = vld [vmem:[#allocation2 + $0xf8] sm:$0xff] }
 0x4e4   : > { %v2116_v9 = vpop.f32.mrf.mxu1 }
 0x4e5   : > { %v3871_v11 = vadd.f32 %v2165_v7, %v1674_v4  ;;  %v2117_v12 = vadd.f32 %v2116_v9, %v2027_v8  ;;  %v1660_v9 = vld [vmem:[#allocation2 + $0xe8] sm:$0xff] }
 0x4e7   : > { %2240 = vst [vmem:[#allocation2 + $0xa8] sm:$0xff] %v3871_v11  ;;  %v2189_v13 = vadd.f32 %v2117_v12, %v1655_v10 }
 0x4e9   : > { %2221 = vst [vmem:[#allocation2 + $0x68] sm:$0xff] %v2189_v13  ;;  %v2077_v17 = vpop.f32.mrf.mxu2  ;;  %v2292_v15 = vadd.f32 %v3853_v6, %v2189_v13 }
 0x4ea   : > { %v2166_v19 = vpop.f32.mrf.mxu3 }
 0x4eb   : > { %v2167_v16 = vadd.f32 %v2166_v19, %v2077_v17  ;;  %v2030_v20 = vpop.f32.mrf.mxu0  ;;  %v2324_v23 = vmax.f32 %v2292_v15, 0.0 }
 0x4ec   : > { %v2119_v26 = vpop.f32.mrf.mxu1 }
 0x4ed   : > { %v3876_v27 = vadd.f32 %v2167_v16, %v1675_v18  ;;  %v2120_v28 = vadd.f32 %v2119_v26, %v2030_v20  ;;  %v3878_v29 = vpack.c.bf16 %v2324_v23, %v2323_v22  ;;  %v1680_v18 = vld [vmem:[#allocation2 + $0x20] sm:$0xff]  ;;  %v1661_v22 = vld [vmem:[#allocation2 + $0xb8] sm:$0xff] }
 0x4ef   : > { %2241 = vst [vmem:[#allocation2 + $0xd0] sm:$0xff] %v3876_v27  ;;  %v2190_v30 = vadd.f32 %v2120_v28, %v1656_v25 }
 0x4f1   : > { %2222 = vst [vmem:[#allocation2 + $0x30] sm:$0xff] %v2190_v30  ;;  %v2080_v31 = vpop.f32.mrf.mxu2  ;;  %v2293_v41 = vadd.f32 %v3853_v6, %v2190_v30 }
 0x4f2   : > { %v2169_v33 = vpop.f32.mrf.mxu3 }
 0x4f3   : > { %v2170_v34 = vadd.f32 %v2169_v33, %v2080_v31  ;;  %v2032_v35 = vpop.f32.mrf.mxu0  ;;  %v2325_v50 = vmax.f32 %v2293_v41, 0.0  ;;  %v1681_v31 = vld [vmem:[#allocation2 + $0x98] sm:$0xff] }
 0x4f4   : > { %v2121_v38 = vpop.f32.mrf.mxu1 }
 0x4f5   : > { %v3881_v39 = vadd.f32 %v2170_v34, %v1676_v32  ;;  %v2122_v40 = vadd.f32 %v2121_v38, %v2032_v35 }
 0x4f7   : > { %2242 = vst [vmem:[#allocation2 + $0x10] sm:$0xff] %v3881_v39  ;;  %v2191_v37 = vadd.f32 %v2122_v40, %v1657_v36  ;;  %v1662_v36 = vld [vmem:[#allocation2 + $0x60] sm:$0xff] }
 0x4f9   : > { %2223 = vst [vmem:[#allocation2 + $0x48] sm:$0xff] %v2191_v37  ;;  %v2082_v43 = vpop.f32.mrf.mxu2  ;;  %v2294_v44 = vadd.f32 %v3853_v6, %v2191_v37 }
 0x4fa   : > { %v2171_v47 = vpop.f32.mrf.mxu3 }
 0x4fb   : > { %v2172_v48 = vadd.f32 %v2171_v47, %v2082_v43  ;;  %v2035_v49 = vpop.f32.mrf.mxu0  ;;  %v2326_v51 = vmax.f32 %v2294_v44, 0.0 }
 0x4fc   : > { %v2124_v45 = vpop.f32.mrf.mxu1 }
 0x4fd   : > { %v3886_v53 = vadd.f32 %v2172_v48, %v1677_v46  ;;  %v2125_v54 = vadd.f32 %v2124_v45, %v2035_v49  ;;  %v3888_v55 = vpack.c.bf16 %v2326_v51, %v2325_v50  ;;  %v2313_v45 = vadd.f32 %v3853_v6, %v3881_v39 }
 0x4ff   : > { %2243 = vst [vmem:[#allocation2 + $0x28] sm:$0xff] %v3886_v53  ;;  %v3891_v56 = vadd.f32 %v2125_v54, %v1658_v52  ;;  %v2314_v54 = vadd.f32 %v3853_v6, %v3886_v53 }
 0x501   : > { %2224 = vst [vmem:[#allocation2 + $0x80] sm:$0xff] %v3891_v56  ;;  %v2085_v57 = vpop.f32.mrf.mxu2 }
 0x502   : > { %v2174_v60 = vpop.f32.mrf.mxu3 }
 0x503   : > { %v2175_v61 = vadd.f32 %v2174_v60, %v2085_v57  ;;  %v2037_v58 = vpop.f32.mrf.mxu0  ;;  %v1663_v57 = vld [vmem:[#allocation2 + $0xf0] sm:$0xff] }
 0x504   : > { %v2126_v21 = vpop.f32.mrf.mxu1 }
 0x505   : > { %v2212_v0 = vadd.f32 %v2175_v61, %v1678_v59  ;;  %v2127_v1 = vadd.f32 %v2126_v21, %v2037_v58  ;;  %v2311_v58 = vadd.f32 %v3853_v6, %v3871_v11  ;;  %v2345_v21 = vmax.f32 %v2313_v45, 0.0 }
 0x507   : > { %2244 = vst [vmem:[#allocation2 + $0xa0] sm:$0xff] %v2212_v0  ;;  %v3894_v3 = vadd.f32 %v2127_v1, %v1659_v63  ;;  %v2315_v41 = vadd.f32 %v3853_v6, %v2212_v0  ;;  %v2346_v0 = vmax.f32 %v2314_v54, 0.0  ;;  %v2312_v1 = vadd.f32 %v3853_v6, %v3876_v27 }
 0x509   : > { %2225 = vst [vmem:[#allocation2 + $0x88] sm:$0xff] %v3894_v3  ;;  %v2087_v4 = vpop.f32.mrf.mxu2  ;;  %v2347_v49 = vmax.f32 %v2315_v41, 0.0  ;;  %v2344_v53 = vmax.f32 %v2312_v1, 0.0 }
 0x50a   : > { %v2176_v7 = vpop.f32.mrf.mxu3 }
 0x50b   : > { %v2177_v8 = vadd.f32 %v2176_v7, %v2087_v4  ;;  %v2040_v10 = vpop.f32.mrf.mxu0  ;;  %v2364_v4 = vpack.c.bf16 %v2346_v0, %v2345_v21  ;;  %v1664_v7 = vld [vmem:[#allocation2 + $0x8] sm:$0xff]  ;;  %v3193_v21 = vld [vmem:[#allocation10 + $0x4] sm:$0xf0] }
 0x50c   : > { %v2129_v12 = vpop.f32.mrf.mxu1 }
 0x50d   : > { %v2213_v13 = vadd.f32 %v2177_v8, %v1679_v5  ;;  %v2130_v14 = vadd.f32 %v2129_v12, %v2040_v10  ;;  %v2343_v5 = vmax.f32 %v2311_v58, 0.0 }
 0x50f   : > { %2245 = vst [vmem:[#allocation2 + $0xf8] sm:$0xff] %v2213_v13  ;;  %v3897_v17 = vadd.f32 %v2130_v14, %v1660_v9  ;;  %v2316_v43 = vadd.f32 %v3853_v6, %v2213_v13  ;;  %v2363_v12 = vpack.c.bf16 %v2344_v53, %v2343_v5  ;;  %v1665_v13 = vld [vmem:[#allocation2 + $0x78] sm:$0xff]  ;;  %v2433_v5 = vld [vmem:[%s4012_s7 + $0x70] sm:$0xff] }
 0x511   : > { %2226 = vst [vmem:[#allocation2 + $0xe8] sm:$0xff] %v3897_v17  ;;  %v2090_v15 = vpop.f32.mrf.mxu2  ;;  %v2348_v50 = vmax.f32 %v2316_v43, 0.0  ;;  %v2295_v43 = vadd.f32 %v3853_v6, %v3891_v56 }
 0x512   : > { %v2179_v19 = vpop.f32.mrf.mxu3 }
 0x513   : > { %v2180_v16 = vadd.f32 %v2179_v19, %v2090_v15  ;;  %v2042_v20 = vpop.f32.mrf.mxu0  ;;  %v2365_v61 = vpack.c.bf16 %v2348_v50, %v2347_v49 }
 0x514   : > { %v2131_v23 = vpop.f32.mrf.mxu1 }
 0x515   : > { %v2214_v25 = vadd.f32 %v2180_v16, %v1680_v18  ;;  %v2132_v26 = vadd.f32 %v2131_v23, %v2042_v20 }
 0x517   : > { %2246 = vst [vmem:[#allocation2 + $0x20] sm:$0xff] %v2214_v25  ;;  %v3900_v28 = vadd.f32 %v2132_v26, %v1661_v22  ;;  %v2317_v35 = vadd.f32 %v3853_v6, %v2214_v25  ;;  %v1666_v26 = vld [vmem:[#allocation2 + $0x38] sm:$0xff] }
 0x519   : > { %2227 = vst [vmem:[#allocation2 + $0xb8] sm:$0xff] %v3900_v28  ;;  %v2092_v30 = vpop.f32.mrf.mxu2  ;;  %v2349_v47 = vmax.f32 %v2317_v35, 0.0  ;;  %v2297_v35 = vadd.f32 %v3853_v6, %v3897_v17  ;;  %v2327_v17 = vmax.f32 %v2295_v43, 0.0 }
 0x51a   : > { %v2181_v32 = vpop.f32.mrf.mxu3 }
 0x51b   : > { %v2182_v33 = vadd.f32 %v2181_v32, %v2092_v30  ;;  %v2045_v34 = vpop.f32.mrf.mxu0 }
 0x51c   : > { %v2134_v38 = vpop.f32.mrf.mxu1 }
 0x51d   : > { %v2215_v40 = vadd.f32 %v2182_v33, %v1681_v31  ;;  %v2135_v37 = vadd.f32 %v2134_v38, %v2045_v34  ;;  %v2298_v33 = vadd.f32 %v3853_v6, %v3900_v28 }
 0x51f   : > { %2247 = vst [vmem:[#allocation2 + $0x98] sm:$0xff] %v2215_v40  ;;  %v2196_v44 = vadd.f32 %v2135_v37, %v1662_v36  ;;  %v2318_v46 = vadd.f32 %v3853_v6, %v2215_v40  ;;  %v2330_v38 = vmax.f32 %v2298_v33, 0.0  ;;  %v2296_v40 = vadd.f32 %v3853_v6, %v3894_v3  ;;  %v2475_v33 = vld [vmem:[#allocation11 + $0x58] sm:$0xff] }
 0x520   : > { %v2329_v37 = vmax.f32 %v2297_v35, 0.0  ;;  %v2472_v35 = vld [vmem:[#allocation11 + $0x40] sm:$0xff] }
 0x521   : > { %2228 = vst [vmem:[#allocation2 + $0x60] sm:$0xff] %v2196_v44  ;;  %v2350_v48 = vmax.f32 %v2318_v46, 0.0  ;;  %v2299_v25 = vadd.f32 %v3853_v6, %v2196_v44  ;;  %v1667_v44 = vld [vmem:[#allocation2 + $0x58] sm:$0xff] }
 0x522   : > { %v2356_v46 = vpack.c.bf16 %v2330_v38, %v2329_v37  ;;  %v2470_v38 = vld [vmem:[#allocation11 + $0x30] sm:$0xff]  ;;  %v2469_v37 = vld [vmem:[#allocation11 + $0x28] sm:$0xff] }
 0x523   : > { %v2047_v51 = vpop.f32.mrf.mxu0  ;;  %v2366_v52 = vpack.c.bf16 %v2350_v48, %v2349_v47  ;;  %v2328_v48 = vmax.f32 %v2296_v40, 0.0 }
 0x524   : > { %v2136_v59 = vpop.f32.mrf.mxu1 }
 0x525   : > { %v2137_v60 = vadd.f32 %v2136_v59, %v2047_v51  ;;  %2395 = vmatpush.bf16.msrb.mxu3 %v2366_v52  ;;  %v2355_v50 = vpack.c.bf16 %v2328_v48, %v2327_v17  ;;  %v1668_v52 = vld [vmem:[#allocation2 + $0x40] sm:$0xff] }
 0x527   : > { %v2197_v63 = vadd.f32 %v2137_v60, %v1663_v57  ;;  %v1669_v57 = vld [vmem:[#allocation2 + $0xc8] sm:$0xff] }
 0x529   : > { %2229 = vst [vmem:[#allocation2 + $0xf0] sm:$0xff] %v2197_v63  ;;  %2396 = vmatpush.bf16.msrb.mxu3 %v2365_v61  ;;  %v2300_v16 = vadd.f32 %v3853_v6, %v2197_v63  ;;  %v3076_v63 = vld [vmem:[#allocation10] sm:$0xf] }
 0x52a   : > { %v3077_v1 = vor.u32 %v3193_v21, %v3076_v63  ;;  %v3389_v63 = vld [vmem:[%s4015_s10] ss:$0 sm:$0xff] }
 0x52b   : > { %v2050_v39 = vpop.f32.mrf.mxu0 }
 0x52c   : > { %v2139_v8 = vpop.f32.mrf.mxu1 }
 0x52d   : > { %v2140_v10 = vadd.f32 %v2139_v8, %v2050_v39  ;;  %2397 = vmatpush.bf16.msrb.mxu3 %v2364_v4  ;;  %v2432_v8 = vld [vmem:[%s4012_s7 + $0x68] sm:$0xff] }
 0x52f   : > { %v2198_v9 = vadd.f32 %v2140_v10, %v1664_v7 }
 0x531   : > { %2230 = vst [vmem:[#allocation2 + $0x8] sm:$0xff] %v2198_v9  ;;  %2398 = vmatpush.bf16.msrb.mxu3 %v2363_v12  ;;  %v2301_v18 = vadd.f32 %v3853_v6, %v2198_v9  ;;  %v3192_v9 = vld [vmem:[#allocation10 + $0x4] sm:$0xf] }
 0x533   : > { %v2052_v11 = vpop.f32.mrf.mxu0  ;;  %v2333_v20 = vmax.f32 %v2301_v18, 0.0  ;;  %v2426_v18 = vld [vmem:[%s4012_s7 + $0x38] sm:$0xff] }
 0x534   : > { %v2141_v14 = vpop.f32.mrf.mxu1 }
 0x535   : > { %v2142_v15 = vadd.f32 %v2141_v14, %v2052_v11  ;;  %2399 = vmatpush.bf16.msrb.mxu3 %v3869_v2  ;;  %v2332_v2 = vmax.f32 %v2300_v16, 0.0  ;;  %v2429_v14 = vld [vmem:[%s4012_s7 + $0x50] sm:$0xff]  ;;  %v2424_v16 = vld [vmem:[%s4012_s7 + $0x28] sm:$0xff] }
 0x537   : > { %v2199_v27 = vadd.f32 %v2142_v15, %v1665_v13  ;;  %v2430_v13 = vld [vmem:[%s4012_s7 + $0x58] sm:$0xff]  ;;  %v2428_v15 = vld [vmem:[%s4012_s7 + $0x48] sm:$0xff] }
 0x539   : > { %2231 = vst [vmem:[#allocation2 + $0x78] sm:$0xff] %v2199_v27  ;;  %2400 = vmatpush.bf16.msrb.mxu3 %v3861_v42  ;;  %v2302_v19 = vadd.f32 %v3853_v6, %v2199_v27  ;;  %v2331_v42 = vmax.f32 %v2299_v25, 0.0  ;;  %v2427_v27 = vld [vmem:[%s4012_s7 + $0x40] sm:$0xff]  ;;  %v2420_v25 = vld [vmem:[%s4012_s7 + $0x8] sm:$0xff] }
 0x53b   : > { %v2334_v22 = vmax.f32 %v2302_v19, 0.0  ;;  %v2055_v23 = vpop.f32.mrf.mxu0  ;;  %v2357_v36 = vpack.c.bf16 %v2332_v2, %v2331_v42  ;;  %v2425_v19 = vld [vmem:[%s4012_s7 + $0x30] sm:$0xff]  ;;  %v2476_v2 = vld [vmem:[#allocation11 + $0x60] sm:$0xff]  ;;  %v2473_v42 = vld [vmem:[#allocation11 + $0x48] sm:$0xff] }
 0x53c   : > { %v2144_v30 = vpop.f32.mrf.mxu1 }
 0x53d   : > { %v2358_v31 = vpack.c.bf16 %v2334_v22, %v2333_v20  ;;  %v2145_v32 = vadd.f32 %v2144_v30, %v2055_v23  ;;  %v2423_v20 = vld [vmem:[%s4012_s7 + $0x20] sm:$0xff]  ;;  %v2422_v22 = vld [vmem:[%s4012_s7 + $0x18] sm:$0xff]  ;;  %v2421_v23 = vld [vmem:[%s4012_s7 + $0x10] sm:$0xff] }
 0x53e   : > { %v2479_v30 = vld [vmem:[#allocation11 + $0x78] sm:$0xff] }
 0x53f   : > { %2381 = vmatpush.bf16.msrb.mxu2 %v2358_v31  ;;  %v2200_v34 = vadd.f32 %v2145_v32, %v1666_v26  ;;  %v2419_v26 = vld [vmem:[%s4012_s7] sm:$0xff]  ;;  %v2478_v31 = vld [vmem:[#allocation11 + $0x70] sm:$0xff]  ;;  %v2477_v32 = vld [vmem:[#allocation11 + $0x68] sm:$0xff] }
 0x541   : > { %2232 = vst [vmem:[#allocation2 + $0x38] sm:$0xff] %v2200_v34 }
 0x543   : > { %2382 = vmatpush.bf16.msrb.mxu2 %v2357_v36  ;;  %v2057_v41 = vpop.f32.mrf.mxu0  ;;  %v2471_v36 = vld [vmem:[#allocation11 + $0x38] sm:$0xff] }
 0x544   : > { %v2146_v28 = vpop.f32.mrf.mxu1 }
 0x545   : > { %v2147_v47 = vadd.f32 %v2146_v28, %v2057_v41  ;;  %v2367_v41 = vld [vmem:[#allocation3] sm:$0xff] }
 0x546   : > { %v2468_v28 = vld [vmem:[#allocation11 + $0x20] sm:$0xff] }
 0x547   : > { %2383 = vmatpush.bf16.msrb.mxu2 %v2356_v46  ;;  %v2201_v49 = vadd.f32 %v2147_v47, %v1667_v44  ;;  %v2467_v47 = vld [vmem:[#allocation11 + $0x18] sm:$0xff] }
 0x549   : > { %2233 = vst [vmem:[#allocation2 + $0x58] sm:$0xff] %v2201_v49 }
 0x54b   : > { %2384 = vmatpush.bf16.msrb.mxu2 %v2355_v50  ;;  %v2060_v51 = vpop.f32.mrf.mxu0 }
 0x54c   : > { %v2149_v3 = vpop.f32.mrf.mxu1 }
 0x54d   : > { %v2150_v45 = vadd.f32 %v2149_v3, %v2060_v51  ;;  %v2465_v3 = vld [vmem:[#allocation11 + $0x8] sm:$0xff] }
 0x54f   : > { %2385 = vmatpush.bf16.msrb.mxu2 %v3888_v55  ;;  %v2202_v54 = vadd.f32 %v2150_v45, %v1668_v52  ;;  %v2304_v55 = vadd.f32 %v3853_v6, %v2201_v49  ;;  %v2368_v49 = vld [vmem:[#allocation3 + $0x8] sm:$0xff]  ;;  %v2466_v52 = vld [vmem:[#allocation11 + $0x10] sm:$0xff]  ;;  %v2464_v45 = vld [vmem:[#allocation11] sm:$0xff] }
 0x551   : > { %2234 = vst [vmem:[#allocation2 + $0x40] sm:$0xff] %v2202_v54  ;;  %v2305_v58 = vadd.f32 %v3853_v6, %v2202_v54  ;;  %v2336_v7 = vmax.f32 %v2304_v55, 0.0  ;;  %v3388_v54 = vld [vmem:[%s4013_s8] ss:$0 sm:$0xff] }
 0x553   : > { %2386 = vmatpush.bf16.msrb.mxu2 %v3878_v29  ;;  %v2062_v56 = vpop.f32.mrf.mxu0  ;;  %v2434_v29 = vld [vmem:[%s4012_s7 + $0x78] sm:$0xff]  ;;  %v2337_v39 = vmax.f32 %v2305_v58, 0.0 }
 0x554   : > { %v2151_v59 = vpop.f32.mrf.mxu1 }
 0x555   : > { %v2152_v60 = vadd.f32 %v2151_v59, %v2062_v56 }
 0x557   : > { %2387 = vmatpush.bf16.msrb.mxu2 %v3866_v62  ;;  %v2203_v61 = vadd.f32 %v2152_v60, %v1669_v57  ;;  %v2303_v62 = vadd.f32 %v3853_v6, %v2200_v34  ;;  %v2474_v34 = vld [vmem:[#allocation11 + $0x50] sm:$0xff] }
 0x559   : > { %2235 = vst [vmem:[#allocation2 + $0xc8] sm:$0xff] %v2203_v61  ;;  %v2306_v0 = vadd.f32 %v3853_v6, %v2203_v61  ;;  %v2335_v10 = vmax.f32 %v2303_v62, 0.0  ;;  %v2431_v6 = vld [vmem:[%s4012_s7 + $0x60] sm:$0xff] }
 0x55b   : > { %2388 = vmatpush.bf16.msrb.mxu2 %v3858_v24  ;;  %v2338_v4 = vmax.f32 %v2306_v0, 0.0  ;;  %v3078_v24 = vld [vmem:[#allocation10 + $0x8] sm:$0xf0]  ;;  %v2359_v12 = vpack.c.bf16 %v2336_v7, %v2335_v10 }
 0x55c   : > { %v3081_v11 = vor.u32 %v3192_v9, %v3078_v24 }
 0x55d   : > { %v2360_v53 = vpack.c.bf16 %v2338_v4, %v2337_v39 }
 0x55e   : > { %2389 = vmatmul.bf16.vlgmr.msrb.gmra.mxu2 %v3077_v1 }
 0x55f   : > { %2439 = vmatpush.msra.mxu2 %v2434_v29  ;;  %2401 = vmatpush.bf16.msrb.mxu3 %v2360_v53 }
 0x561   : > { %2440 = vmatpush.msra.mxu2 %v2433_v5 }
 0x563   : > { %2441 = vmatpush.msra.mxu2 %v2432_v8  ;;  %2402 = vmatpush.bf16.msrb.mxu3 %v2359_v12 }
 0x565   : > { %2442 = vmatpush.msra.mxu2 %v2431_v6 }
 0x566   : > { %2403 = vmatmul.bf16.vlgmr.msrb.gmra.mxu3 %v3081_v11 }
 0x567   : > { %2443 = vmatpush.msra.mxu2 %v2430_v13  ;;  %2484 = vmatpush.msra.mxu3 %v2479_v30 }
 0x569   : > { %2444 = vmatpush.msra.mxu2 %v2429_v14  ;;  %2485 = vmatpush.msra.mxu3 %v2478_v31 }
 0x56b   : > { %2445 = vmatpush.msra.mxu2 %v2428_v15  ;;  %2486 = vmatpush.msra.mxu3 %v2477_v32 }
 0x56d   : > { %2446 = vmatpush.msra.mxu2 %v2427_v27  ;;  %2487 = vmatpush.msra.mxu3 %v2476_v2 }
 0x56f   : > { %2447 = vmatpush.msra.mxu2 %v2426_v18  ;;  %2488 = vmatpush.msra.mxu3 %v2475_v33 }
 0x571   : > { %2448 = vmatpush.msra.mxu2 %v2425_v19  ;;  %2489 = vmatpush.msra.mxu3 %v2474_v34 }
 0x573   : > { %2449 = vmatpush.msra.mxu2 %v2424_v16  ;;  %2490 = vmatpush.msra.mxu3 %v2473_v42 }
 0x575   : > { %2450 = vmatpush.msra.mxu2 %v2423_v20  ;;  %2491 = vmatpush.msra.mxu3 %v2472_v35 }
 0x577   : > { %2451 = vmatpush.msra.mxu2 %v2422_v22  ;;  %2492 = vmatpush.msra.mxu3 %v2471_v36 }
 0x579   : > { %2452 = vmatpush.msra.mxu2 %v2421_v23  ;;  %2493 = vmatpush.msra.mxu3 %v2470_v38 }
 0x57b   : > { %2453 = vmatpush.msra.mxu2 %v2420_v25  ;;  %2494 = vmatpush.msra.mxu3 %v2469_v37 }
 0x57d   : > { %2454 = vmatpush.msra.mxu2 %v2419_v26  ;;  %2495 = vmatpush.msra.mxu3 %v2468_v28 }
 0x57f   : > { %2496 = vmatpush.msra.mxu3 %v2467_v47 }
 0x581   : > { %2497 = vmatpush.msra.mxu3 %v2466_v52 }
 0x583   : > { %2498 = vmatpush.msra.mxu3 %v2465_v3 }
 0x585   : > { %2499 = vmatpush.msra.mxu3 %v2464_v45 }
 0x5e1   : > { %v2390_v40 = vpop.f32.mrf.mxu2 }
 0x5e9   : > { %v2404_v43 = vpop.f32.mrf.mxu3  ;;  %v2392_v48 = vpop.f32.mrf.mxu2 }
 0x5ea   : > { %v2405_v44 = vadd.f32 %v2404_v43, %v2390_v40 }
 0x5ec   : > { %v2409_v46 = vadd.f32 %v2405_v44, %v2367_v41 }
 0x5ee   : > { %2411 = vst [vmem:[#allocation3] sm:$0xff] %v2409_v46  ;;  %2455 = vmatmul.f32.vlgmr.msra.gmra.mxu2 %v2409_v46 }
 0x5f1   : > { %v2406_v17 = vpop.f32.mrf.mxu3 }
 0x5f2   : > { %v2407_v50 = vadd.f32 %v2406_v17, %v2392_v48 }
 0x5f4   : > { %v2410_v51 = vadd.f32 %v2407_v50, %v2368_v49 }
 0x5f6   : > { %2412 = vst [vmem:[#allocation3 + $0x8] sm:$0xff] %v2410_v51  ;;  %2458 = vmatmul.f32.gmra.mxu2 %v2410_v51 }
 0x671   : > { %v2456_v56 = vpop.f32.mrf.mxu2 }
 0x672   : > { %v2457_v57 = vadd.f32 %v3388_v54, %v2456_v56 }
 0x674   : > { %v2462_v59 = vmax.f32 %v2457_v57, 0.0 }
 0x676   : > { %2500 = vmatmul.f32.vlgmr.msra.gmra.mxu3 %v2462_v59 }
 0x679   : > { %v2459_v60 = vpop.f32.mrf.mxu2 }
 0x67a   : > { %v2460_v61 = vadd.f32 %v3388_v54, %v2459_v60 }
 0x67c   : > { %v2463_v58 = vmax.f32 %v2460_v61, 0.0 }
 0x67e   : > { %2503 = vmatmul.f32.gmra.mxu3 %v2463_v58 }
 0x6f9   : > { %v2501_v21 = vpop.f32.mrf.mxu3 }
 0x6fa   : > { %v2502_v0 = vadd.f32 %v3389_v63, %v2501_v21 }
 0x6fc   : > { %2507 = vst [vmem:[#allocation13] sm:$0xff] %v2502_v0 }
 0x701   : > { %v2504_v55 = vpop.f32.mrf.mxu3 }
 0x702   : > { %v2505_v29 = vadd.f32 %v3389_v63, %v2504_v55 }
 0x704   : > { %2508 = vst [vmem:[#allocation13 + $0x8] sm:$0xff] %v2505_v29 }
 0x705 PF: > { %s4025_s24 = sadd.s32 4294967295, %s3576_s19   ;;  %s2516_s15 = sshll.u32 %s4016_s11, 4  ;;  %s2517_s15 = int_to_ptr.hbm [resolvable:$true] %s2516_s15 }
 0x706   : > { %p3346_p10 = scmp.eq.s32.totalorder %s4025_s24, 1  ;;  %s3589_s20 = smov [#allocation13]  }
 0x707   : > { %s2514_s21 = sshll.u32 %s3589_s20, 4  ;;  %s3590_s26 = smov 128   ;;  %s2515_s21 = int_to_ptr.vmem [resolvable:$true] %s2514_s21 }
 0x708   : > { %s3591_s22 = smov 8  }
 0x709   : > { %3322 = dma.vmem_to_hbm [thread:$0]  (%p3346_p10), %s2515_s21, 256, %s2517_s15, [#allocation7], %s3590_s26, %s3590_s26, %s3591_s22  }
 0x70a   : > { %3563 = dma.done.wait (%p3346_p10), [#allocation7], 256  }
 0x70b   : > { %3565 = vsyncadd (%p3346_p10), [#allocation7], 4294967040 }
 0x70c PF: > { %s25_s19 = sadd.s32 1, %s3576_s19   ;;  %s4026_s17 = sld [smem:[#allocation18_spill]] }
 0x70d   : > { %p22_p11 = scmp.ge.s32.totalorder %s25_s19, 4   ;;  %s4027_s18 = smov %s4029_s29 }
 0x70f   :  { %24 = sbr.rel (!%p22_p11) target bundleno = 7 (0x7), region = 140 }
 0x714   :  { %2533 = vsyncpa [#allocation6], 1 }
 0x715   :  { %2535 = vsyncpa [#allocation6 + $0x1], 1 }
 0x716   :  { %2536 = vsyncpa [#allocation9], 1 }
 0x717   :  { %2537 = vsyncpa [#allocation12], 1 }
 0x718   :  { %2538 = vsyncpa [#allocation7], 1 }
 0x719   :  { %2540 = vsyncpa [#allocation7 + $0x1], 1 }

</bundles_post_ra>
